<compile_context>
chip_gen: v6e
topology: v6e:2x2x1
jax: 0.10.0
libtpu: 0.0.40
codegen_flags: <defaults>
</compile_context>

<pallas_src>
import jax
import jax.numpy as jnp
from jax.experimental import pallas as pl
from jax.experimental.pallas import tpu as pltpu


def _round_up(x, m):
    return (x + m - 1) // m * m


def _pick_tile(n_pad):
    # >= 256 so a single block fills the 256x256 MXU on v6e/v7x (128 would use
    # a quarter of it and tank arithmetic intensity).  Prefer the largest tile
    # that still leaves the "parallel" i axis with >= 2 blocks so the grid can
    # shard across v7x's two TensorCores.
    for t in (512, 256):
        if n_pad % t == 0 and n_pad // t >= 2:
            return t
    return 256


# --------------------------- kernel 1: N and E ------------------------------ #
# Grid (i, j, k):
#   i : output row-block of N / E                      -> "parallel" (megacore)
#   j : column-block of A  (rowsum / diag3 reduction)  -> "arbitrary"
#   k : contraction block of A @ A                     -> "arbitrary", innermost
#
# Inputs:
#   a_row_ref : (t, n_pad) f32 row panel A[i-block, :]  — resident per i-block
#               (BlockSpec index (i, 0): re-DMA'd only when i changes).
#   a_rhs_ref : (t, t) mxu_dtype block A[k-block, j-block] — streamed.
#
# Scratch (persists across grid steps):
#   acc    (t, t) f32 : running (A@A)[i-block, j-block] = sum_k A[i,k] @ A[k,j]
#   rowsum (t, 1) f32 : sum_j A[i-block, j]                       (== N block)
#   diag3  (t, 1) f32 : sum_j (A@A)[i-block, j] * A[i-block, j]   (== diag(A^3))
#                       NOTE: uses A[i, j] (not A[j, i]) -- valid ONLY because
#                       the wrapper symmetrizes A, so no transpose is needed.

def _make_ne_kernel(t, mxu_dtype):
    def kernel(a_row_ref, a_rhs_ref, n_ref, e_ref,
               acc_ref, rowsum_ref, diag3_ref):
        j = pl.program_id(1)
        k = pl.program_id(2)
        nj = pl.num_programs(1)
        nk = pl.num_programs(2)

        @pl.when(jnp.logical_and(j == 0, k == 0))
        def _():
            rowsum_ref[...] = jnp.zeros_like(rowsum_ref)
            diag3_ref[...] = jnp.zeros_like(diag3_ref)

        @pl.when(k == 0)
        def _():
            acc_ref[...] = jnp.zeros_like(acc_ref)

        # A[i-block, k-block] is a lane-aligned slice of the resident f32 row
        # panel; the per-step t*t cast to the MXU operand dtype is negligible
        # next to the t^3 MXU MACs.
        k_off = pl.multiple_of(k * t, t)
        lhs = a_row_ref[:, pl.ds(k_off, t)]
        acc_ref[...] += jnp.dot(lhs.astype(mxu_dtype), a_rhs_ref[...],
                                preferred_element_type=jnp.float32)

        @pl.when(k == nk - 1)
        def _():
            # f32 A[i-block, j-block] straight from the resident panel: exact
            # rowsum (N) regardless of the MXU operand dtype.
            j_off = pl.multiple_of(j * t, t)
            a_ij = a_row_ref[:, pl.ds(j_off, t)]
            rowsum_ref[...] += jnp.sum(a_ij, axis=1, keepdims=True)
            # diag(A^3)[i] = sum_j (A@A)[i,j] * A[i,j]  — REQUIRES symmetric A
            # (the wrapper guarantees this); directed A would need A[j,i].
            diag3_ref[...] += jnp.sum(acc_ref[...] * a_ij, axis=1, keepdims=True)

        @pl.when(jnp.logical_and(j == nj - 1, k == nk - 1))
        def _():
            n_ref[...] = rowsum_ref[...]
            e_ref[...] = rowsum_ref[...] + 0.5 * diag3_ref[...]

    return kernel


def extract_ne(A, *, mxu_dtype=jnp.bfloat16):
    """N = sum(A, 1); E = N + 0.5 * diag(A^3).

    A must be square, float32, SYMMETRIC, with side a multiple of 256.
    """
    n = A.shape[0]
    t = _pick_tile(n)
    g = n // t
    A_rhs = A.astype(mxu_dtype)        # single wrapper-side cast of the streamed operand

    # Explicit VMEM budget (v7x: 64 MiB physical / 32 MiB default scoped / TC).
    itemsize = jnp.dtype(mxu_dtype).itemsize
    vmem_need = (2 * t * n * 4          # resident f32 row panel (2 pipeline slots)
                 + 2 * t * t * itemsize # double-buffered RHS stream
                 + t * t * 4            # f32 accumulator
                 + 8 * t * 4            # rowsum/diag3 + small output blocks
                 + (2 << 20))           # Mosaic internal slack
    vmem_limit = int(min(max(vmem_need, 32 << 20), 48 << 20))

    return pl.pallas_call(
        _make_ne_kernel(t, mxu_dtype),
        out_shape=(jax.ShapeDtypeStruct((n, 1), jnp.float32),
                   jax.ShapeDtypeStruct((n, 1), jnp.float32)),
        grid=(g, g, g),
        in_specs=[pl.BlockSpec((t, n), lambda i, j, k: (i, 0)),   # f32 row panel (resident)
                  pl.BlockSpec((t, t), lambda i, j, k: (k, j))],  # mxu-dtype RHS stream
        out_specs=(pl.BlockSpec((t, 1), lambda i, j, k: (i, 0)),
                   pl.BlockSpec((t, 1), lambda i, j, k: (i, 0))),
        scratch_shapes=[pltpu.VMEM((t, t), jnp.float32),
                        pltpu.VMEM((t, 1), jnp.float32),
                        pltpu.VMEM((t, 1), jnp.float32)],
        compiler_params=pltpu.CompilerParams(
            dimension_semantics=("parallel", "arbitrary", "arbitrary"),
            vmem_limit_bytes=vmem_limit),
    )(A, A_rhs)


# ----------------------- kernel 2: masked anomaly score --------------------- #
# Lane-dense (1, n_pad) inputs: every vreg holds 128 nodes -> unmasked
# loads/stores and 128x fewer EUP (exp/log) pushes than a (n, 1) column layout.

def _score_kernel(bw_ref, n_ref, e_ref, mask_ref, out_ref):
    b = bw_ref[0]                 # scalars in SMEM
    w = bw_ref[1]
    nvec = n_ref[...]             # (1, n_pad)
    evec = e_ref[...]
    mask = mask_ref[...]          # multiplicity of each node in target_lst (0 elsewhere)
    # Non-target / padded lanes use N = 1 so log() stays benign and the mask
    # zeroes their contribution; target lanes use N as-is, matching torch's
    # exp(b) * N**w semantics (including N == 0 edge cases).
    safe_n = jnp.where(mask > 0, nvec, 1.0)
    pred = jnp.exp(b + w * jnp.log(safe_n))        # exp(b) * N^w   (EUP)
    resid = pred - evec
    out_ref[...] = jnp.sum(mask * resid * resid, keepdims=True)    # (1, 1)


def anomaly_score(bw, N_row, E_row, mask_row):
    n = N_row.shape[1]
    return pl.pallas_call(
        _score_kernel,
        out_shape=jax.ShapeDtypeStruct((1, 1), jnp.float32),
        grid=(1,),
        in_specs=[pl.BlockSpec(memory_space=pltpu.MemorySpace.SMEM),   # (2,) b, w
                  pl.BlockSpec((1, n), lambda i: (0, 0)),
                  pl.BlockSpec((1, n), lambda i: (0, 0)),
                  pl.BlockSpec((1, n), lambda i: (0, 0))],
        out_specs=pl.BlockSpec((1, 1), lambda i: (0, 0)),
    )(bw, N_row, E_row, mask_row)


# ------------------------------ forward glue -------------------------------- #

def multiple_as_forward(tri, target_lst, n_node, *, mxu_dtype=jnp.bfloat16,
                        return_ne=False):
    n_pad = _round_up(n_node, 256)      # fill the 256-wide MXU on v6e/v7x

    rows = tri[:, 0].astype(jnp.int32)
    cols = tri[:, 1].astype(jnp.int32)
    vals = tri[:, 2].astype(jnp.float32)
    # sparse_coo_tensor(...).to_dense() with duplicate coalescing == scatter-add;
    # built directly at the padded size (padded rows/cols stay exactly zero).
    A = jnp.zeros((n_pad, n_pad), jnp.float32).at[rows, cols].add(vals)
    A = A + A.T - jnp.diag(jnp.diag(A))  # symmetric (the NE kernel RELIES on this)

    N_p, E_p = extract_ne(A, mxu_dtype=mxu_dtype)    # (n_pad, 1) each  [Pallas kernel]
    N = N_p[:n_node]                                 # drop zero-padded rows before the fit
    E = E_p[:n_node]

    # OLS estimation (tiny (n, 2) pinv, kept in plain JAX)
    logN = jnp.log(N + 1e-20)                        # (n, 1)
    logE = jnp.log(E[:, 0] + 1e-20)                  # (n,)
    logN1 = jnp.concatenate([jnp.ones((n_node, 1), jnp.float32), logN], axis=1)
    theta = jnp.linalg.pinv(logN1) @ logE            # (2,) -> b, w

    mask = jnp.zeros((n_node,), jnp.float32).at[
        jnp.asarray(target_lst, jnp.int32)].add(1.0)

    def to_row(v):                                   # lane-dense (1, n_pad) layout
        v = v.reshape(1, -1)
        if n_pad != n_node:
            v = jnp.pad(v, ((0, 0), (0, n_pad - n_node)))
        return v

    score = anomaly_score(theta.astype(jnp.float32),
                          to_row(N), to_row(E), to_row(mask))       # [Pallas kernel]
    score = score.reshape(1)                         # matches torch output shape (1,)
    if return_ne:
        return score, N, E
    return score


# ------------------------------ pure-JAX ref -------------------------------- #

def reference_parts(tri, target_lst, n_node):
    rows = tri[:, 0].astype(jnp.int32)
    cols = tri[:, 1].astype(jnp.int32)
    vals = tri[:, 2].astype(jnp.float32)
    A = jnp.zeros((n_node, n_node), jnp.float32).at[rows, cols].add(vals)
    A = A + A.T - jnp.diag(jnp.diag(A))
    hi = jax.lax.Precision.HIGHEST
    A3 = jnp.matmul(jnp.matmul(A, A, precision=hi), A, precision=hi)
    N = jnp.sum(A, axis=1).reshape(-1, 1)
    E = jnp.sum(A, axis=1) + 0.5 * jnp.diag(A3)
    logN = jnp.log(N + 1e-20)
    logE = jnp.log(E + 1e-20)
    logN1 = jnp.concatenate([jnp.ones((n_node, 1), jnp.float32), logN], axis=1)
    theta = jnp.linalg.pinv(logN1) @ logE
    b, w = theta[0], theta[1]
    tgt = jnp.asarray(target_lst, jnp.int32)
    resid = jnp.exp(b) * N[tgt, 0] ** w - E[tgt]
    score = jnp.sum(resid * resid).reshape(1)
    return score, N, E


# ---------------------------------- main ------------------------------------ #

def _make_inputs(n_node, n_edges, target_lst, seed):
    key = jax.random.PRNGKey(seed)
    k1, k2, k3 = jax.random.split(key, 3)
    rows = jax.random.randint(k1, (n_edges,), 0, n_node)
    cols = jax.random.randint(k2, (n_edges,), 0, n_node)
    vals = jax.random.uniform(k3, (n_edges,), minval=0.5, maxval=1.5, dtype=jnp.float32)
    # guarantee every target node has at least one incident edge (deterministic)
    t = jnp.asarray(target_lst, jnp.int32)
    rows = jnp.concatenate([rows, t])
    cols = jnp.concatenate([cols, (t + 1) % n_node])
    vals = jnp.concatenate([vals, jnp.ones((len(target_lst),), jnp.float32)])
    # tri mimics the float edge-list loaded from adj.txt: columns [src, dst, weight]
    return jnp.stack([rows.astype(jnp.float32), cols.astype(jnp.float32), vals], axis=1)


def _check(name, got, want, rtol, atol):
    got = jnp.asarray(got, jnp.float32)
    want = jnp.asarray(want, jnp.float32)
    err = float(jnp.max(jnp.abs(got - want)))
    lim = rtol * float(jnp.max(jnp.abs(want))) + atol
    assert err <= lim, (name, err, lim)


if __name__ == "__main__":
    target_lst = [3, 17, 42, 99]

    # case 1: n < 256                  -> single-tile grid + zero-padding path
    # case 2: n not a multiple of 256  -> padding path
    # case 3: n_pad = 768, t = 256     -> true (3,3,3) grid: exercises the
    #                                     resident-panel k/j slicing + accumulation
    for n_node, n_edges in ((128, 300), (200, 500), (520, 2600)):
        tri = _make_inputs(n_node, n_edges, target_lst, seed=0)

        score_ref, N_ref, E_ref = reference_parts(tri, target_lst, n_node)
        score_ref = jax.block_until_ready(score_ref)
        scale = float(jnp.sum(E_ref[jnp.asarray(target_lst, jnp.int32)] ** 2))

        for dt in (jnp.bfloat16, jnp.float32):     # default perf path + exact path
            out, N, E = multiple_as_forward(tri, target_lst, n_node,
                                            mxu_dtype=dt, return_ne=True)
            out = jax.block_until_ready(out)
            assert out.shape == (1,)
            assert bool(jnp.isfinite(out).all())
            # N comes from the f32 panel rowsum -> near-exact in both modes.
            _check("N", N[:, 0], N_ref[:, 0], rtol=1e-3, atol=1e-4)
            # E includes the MXU diag(A^3) term (bf16 products, f32 accumulate).
            _check("E", E[:, 0], E_ref, rtol=2e-2, atol=1e-2)
            # The score is a sum of squared regression residuals; allow 5%
            # relative plus a small floor tied to the natural squared-E scale.
            _check("score", out, score_ref, rtol=5e-2, atol=2e-3 * scale)

    print("KERNEL_OK")
</pallas_src>

<mosaic_0001>
module attributes {stable_mosaic.version = 11 : i64} {
  func.func @kernel(%arg0: i32, %arg1: i32, %arg2: i32, %arg3: memref<256x256xf32, #tpu.memory_space<vmem>>, %arg4: memref<256x256xbf16, #tpu.memory_space<vmem>>, %arg5: memref<256x1xf32, #tpu.memory_space<vmem>>, %arg6: memref<256x1xf32, #tpu.memory_space<vmem>>, %arg7: memref<256x256xf32, #tpu.memory_space<vmem>>, %arg8: memref<256x1xf32, #tpu.memory_space<vmem>>, %arg9: memref<256x1xf32, #tpu.memory_space<vmem>>) attributes {dimension_semantics = [#tpu.dimension_semantics<parallel>, #tpu.dimension_semantics<arbitrary>, #tpu.dimension_semantics<arbitrary>], iteration_bounds = array<i64: 1, 1, 1>, scalar_prefetch = 0 : i64, scratch_operands = 3 : i64, tpu.core_type = #tpu.core_type<tc>, window_params = [{transform_indices = @transform_0, window_bounds = array<i64: 256, 256>}, {transform_indices = @transform_1, window_bounds = array<i64: 256, 256>}, {transform_indices = @transform_2, window_bounds = array<i64: 256, 1>}, {transform_indices = @transform_3, window_bounds = array<i64: 256, 1>}]} {
    %c0_i32 = arith.constant 0 : i32
    %0 = arith.cmpi eq, %arg1, %c0_i32 : i32
    %c0_i32_0 = arith.constant 0 : i32
    %1 = arith.cmpi eq, %arg2, %c0_i32_0 : i32
    %2 = arith.andi %0, %1 : i1
    %3 = arith.extui %2 : i1 to i32
    %c0_i32_1 = arith.constant 0 : i32
    %4 = arith.cmpi ne, %3, %c0_i32_1 : i32
    scf.if %4 {
      %cst_15 = arith.constant 0.000000e+00 : f32
      %26 = vector.broadcast %cst_15 : f32 to vector<256x1xf32>
      %c0_16 = arith.constant 0 : index
      %c0_17 = arith.constant 0 : index
      %27 = vector.load %arg8[%c0_16, %c0_17] : memref<256x1xf32, #tpu.memory_space<vmem>>, vector<256x1xf32>
      tpu.vector_store %arg8[%c0_16, %c0_17], %26 {strides = array<i32>} : memref<256x1xf32, #tpu.memory_space<vmem>>, vector<256x1xf32>,
      %cst_18 = arith.constant 0.000000e+00 : f32
      %28 = vector.broadcast %cst_18 : f32 to vector<256x1xf32>
      %c0_19 = arith.constant 0 : index
      %c0_20 = arith.constant 0 : index
      %29 = vector.load %arg9[%c0_19, %c0_20] : memref<256x1xf32, #tpu.memory_space<vmem>>, vector<256x1xf32>
      tpu.vector_store %arg9[%c0_19, %c0_20], %28 {strides = array<i32>} : memref<256x1xf32, #tpu.memory_space<vmem>>, vector<256x1xf32>,
    } else {
    }
    %c0_i32_2 = arith.constant 0 : i32
    %5 = arith.cmpi eq, %arg2, %c0_i32_2 : i32
    %6 = arith.extui %5 : i1 to i32
    %c0_i32_3 = arith.constant 0 : i32
    %7 = arith.cmpi ne, %6, %c0_i32_3 : i32
    scf.if %7 {
      %cst_15 = arith.constant 0.000000e+00 : f32
      %26 = vector.broadcast %cst_15 : f32 to vector<256x256xf32>
      %c0_16 = arith.constant 0 : index
      %c0_17 = arith.constant 0 : index
      %27 = vector.load %arg7[%c0_16, %c0_17] : memref<256x256xf32, #tpu.memory_space<vmem>>, vector<256x256xf32>
      tpu.vector_store %arg7[%c0_16, %c0_17], %26 {strides = array<i32>} : memref<256x256xf32, #tpu.memory_space<vmem>>, vector<256x256xf32>,
    } else {
    }
    %c256_i32 = arith.constant 256 : i32
    %8 = arith.muli %arg2, %c256_i32 : i32
    %9 = tpu.assume_multiple %8, 256 : i32
    %c0 = arith.constant 0 : index
    %10 = arith.index_cast %9 : i32 to index
    %11 = vector.load %arg3[%c0, %10] : memref<256x256xf32, #tpu.memory_space<vmem>>, vector<256x256xf32>
    %c0_4 = arith.constant 0 : index
    %c0_5 = arith.constant 0 : index
    %12 = vector.load %arg7[%c0_4, %c0_5] : memref<256x256xf32, #tpu.memory_space<vmem>>, vector<256x256xf32>
    %13 = arith.truncf %11 : vector<256x256xf32> to vector<256x256xbf16>
    %c0_6 = arith.constant 0 : index
    %c0_7 = arith.constant 0 : index
    %14 = vector.load %arg4[%c0_6, %c0_7] : memref<256x256xbf16, #tpu.memory_space<vmem>>, vector<256x256xbf16>
    %cst = arith.constant dense<0.000000e+00> : vector<256x256xf32>
    %15 = tpu.matmul %13, %14, %cst {dimension_numbers = #tpu.dot_dimension_numbers<[1], [0], [0], [1], [0, 0, 1, 1], [], []>} : vector<256x256xbf16>, vector<256x256xbf16>, vector<256x256xf32> -> vector<256x256xf32>
    %16 = arith.addf %12, %15 : vector<256x256xf32>
    %c0_8 = arith.constant 0 : index
    %c0_9 = arith.constant 0 : index
    %17 = vector.load %arg7[%c0_8, %c0_9] : memref<256x256xf32, #tpu.memory_space<vmem>>, vector<256x256xf32>
    tpu.vector_store %arg7[%c0_8, %c0_9], %16 {strides = array<i32>} : memref<256x256xf32, #tpu.memory_space<vmem>>, vector<256x256xf32>,
    %c0_i32_10 = arith.constant 0 : i32
    %18 = arith.cmpi eq, %arg2, %c0_i32_10 : i32
    %19 = arith.extui %18 : i1 to i32
    %c0_i32_11 = arith.constant 0 : i32
    %20 = arith.cmpi ne, %19, %c0_i32_11 : i32
    scf.if %20 {
      %c256_i32_15 = arith.constant 256 : i32
      %26 = arith.muli %arg1, %c256_i32_15 : i32
      %27 = tpu.assume_multiple %26, 256 : i32
      %c0_16 = arith.constant 0 : index
      %28 = arith.index_cast %27 : i32 to index
      %29 = vector.load %arg3[%c0_16, %28] : memref<256x256xf32, #tpu.memory_space<vmem>>, vector<256x256xf32>
      %c0_17 = arith.constant 0 : index
      %c0_18 = arith.constant 0 : index
      %30 = vector.load %arg8[%c0_17, %c0_18] : memref<256x1xf32, #tpu.memory_space<vmem>>, vector<256x1xf32>
      %cst_19 = arith.constant dense<0.000000e+00> : vector<256xf32>
      %31 = vector.multi_reduction <add>, %29, %cst_19 [1] : vector<256x256xf32> to vector<256xf32>
      %32 = vector.shape_cast %31 : vector<256xf32> to vector<256x1xf32>
      %33 = arith.addf %30, %32 : vector<256x1xf32>
      %c0_20 = arith.constant 0 : index
      %c0_21 = arith.constant 0 : index
      %34 = vector.load %arg8[%c0_20, %c0_21] : memref<256x1xf32, #tpu.memory_space<vmem>>, vector<256x1xf32>
      tpu.vector_store %arg8[%c0_20, %c0_21], %33 {strides = array<i32>} : memref<256x1xf32, #tpu.memory_space<vmem>>, vector<256x1xf32>,
      %c0_22 = arith.constant 0 : index
      %c0_23 = arith.constant 0 : index
      %35 = vector.load %arg9[%c0_22, %c0_23] : memref<256x1xf32, #tpu.memory_space<vmem>>, vector<256x1xf32>
      %c0_24 = arith.constant 0 : index
      %c0_25 = arith.constant 0 : index
      %36 = vector.load %arg7[%c0_24, %c0_25] : memref<256x256xf32, #tpu.memory_space<vmem>>, vector<256x256xf32>
      %37 = arith.mulf %36, %29 : vector<256x256xf32>
      %cst_26 = arith.constant dense<0.000000e+00> : vector<256xf32>
      %38 = vector.multi_reduction <add>, %37, %cst_26 [1] : vector<256x256xf32> to vector<256xf32>
      %39 = vector.shape_cast %38 : vector<256xf32> to vector<256x1xf32>
      %40 = arith.addf %35, %39 : vector<256x1xf32>
      %c0_27 = arith.constant 0 : index
      %c0_28 = arith.constant 0 : index
      %41 = vector.load %arg9[%c0_27, %c0_28] : memref<256x1xf32, #tpu.memory_space<vmem>>, vector<256x1xf32>
      tpu.vector_store %arg9[%c0_27, %c0_28], %40 {strides = array<i32>} : memref<256x1xf32, #tpu.memory_space<vmem>>, vector<256x1xf32>,
    } else {
    }
    %c0_i32_12 = arith.constant 0 : i32
    %21 = arith.cmpi eq, %arg1, %c0_i32_12 : i32
    %c0_i32_13 = arith.constant 0 : i32
    %22 = arith.cmpi eq, %arg2, %c0_i32_13 : i32
    %23 = arith.andi %21, %22 : i1
    %24 = arith.extui %23 : i1 to i32
    %c0_i32_14 = arith.constant 0 : i32
    %25 = arith.cmpi ne, %24, %c0_i32_14 : i32
    scf.if %25 {
      %c0_15 = arith.constant 0 : index
      %c0_16 = arith.constant 0 : index
      %26 = vector.load %arg8[%c0_15, %c0_16] : memref<256x1xf32, #tpu.memory_space<vmem>>, vector<256x1xf32>
      %c0_17 = arith.constant 0 : index
      %c0_18 = arith.constant 0 : index
      %27 = vector.load %arg5[%c0_17, %c0_18] : memref<256x1xf32, #tpu.memory_space<vmem>>, vector<256x1xf32>
      tpu.vector_store %arg5[%c0_17, %c0_18], %26 {strides = array<i32>} : memref<256x1xf32, #tpu.memory_space<vmem>>, vector<256x1xf32>,
      %c0_19 = arith.constant 0 : index
      %c0_20 = arith.constant 0 : index
      %28 = vector.load %arg8[%c0_19, %c0_20] : memref<256x1xf32, #tpu.memory_space<vmem>>, vector<256x1xf32>
      %c0_21 = arith.constant 0 : index
      %c0_22 = arith.constant 0 : index
      %29 = vector.load %arg9[%c0_21, %c0_22] : memref<256x1xf32, #tpu.memory_space<vmem>>, vector<256x1xf32>
      %cst_23 = arith.constant 5.000000e-01 : f32
      %30 = vector.broadcast %cst_23 : f32 to vector<256x1xf32>
      %31 = arith.mulf %30, %29 : vector<256x1xf32>
      %32 = arith.addf %28, %31 : vector<256x1xf32>
      %c0_24 = arith.constant 0 : index
      %c0_25 = arith.constant 0 : index
      %33 = vector.load %arg6[%c0_24, %c0_25] : memref<256x1xf32, #tpu.memory_space<vmem>>, vector<256x1xf32>
      tpu.vector_store %arg6[%c0_24, %c0_25], %32 {strides = array<i32>} : memref<256x1xf32, #tpu.memory_space<vmem>>, vector<256x1xf32>,
    } else {
    }
    return
  }
  func.func @transform_0(%arg0: i32, %arg1: i32, %arg2: i32) -> (i32, i32) {
    %c0_i32 = arith.constant 0 : i32
    %c0_i32_0 = arith.constant 0 : i32
    return %arg0, %c0_i32 : i32, i32
  }
  func.func @transform_1(%arg0: i32, %arg1: i32, %arg2: i32) -> (i32, i32) {
    %c0_i32 = arith.constant 0 : i32
    return %arg2, %arg1 : i32, i32
  }
  func.func @transform_2(%arg0: i32, %arg1: i32, %arg2: i32) -> (i32, i32) {
    %c0_i32 = arith.constant 0 : i32
    %c0_i32_0 = arith.constant 0 : i32
    return %arg0, %c0_i32 : i32, i32
  }
  func.func @transform_3(%arg0: i32, %arg1: i32, %arg2: i32) -> (i32, i32) {
    %c0_i32 = arith.constant 0 : i32
    %c0_i32_0 = arith.constant 0 : i32
    return %arg0, %c0_i32 : i32, i32
  }
}

</mosaic_0001>

<bundles_post_ra>
// kernel: tpu_custom_call.1
= control target key start
LH: loop header
LB: loop body
LE: loop exit
PB: predicated region body
PF: predicated region fallthrough
CT: control target
= control target key end

     0   :  { %9 = vsyncpa [#allocation6], 0  ;;  %s2773_s0 = inlined_call_operand.hbm [shape: f32[256,256], index: 0, kind: input, shape index: {}]   ;;  %s2774_s1 = inlined_call_operand.hbm [shape: bf16[256,256], index: 1, kind: input, shape index: {}]   ;;  %s2775_s2 = inlined_call_operand.vmem [shape: f32[256,1], index: 2, kind: output, shape index: {0}]   ;;  %s2776_s3 = inlined_call_operand.vmem [shape: f32[256,1], index: 3, kind: output, shape index: {1}]  }
   0x1   :  { %10 = vsyncpa [#allocation8], 0  ;;  %s1866_s12 = smov [#allocation5]  }
   0x2   :  { %s16_s13 = sshll.u32 %s1866_s12, 4  ;;  %s17_s13 = int_to_ptr.vmem [resolvable:$true] %s16_s13 }
   0x3   :  { %s1830_s14 = scalar_lea.vmem %s17_s13, 8192  ;;  %p1835_p1 = scmp.lt.s32.totalorder %s17_s13, %s17_s13 }
   0x4   :  { %p1831_p0 = scmp.ne.s32.totalorder %s17_s13, %s1830_s14  ;;  %p1836_p2 = scmp.lt.s32.totalorder %s1830_s14, %s1830_s14 }
   0x6   :  { %p1837_p3 = por %p1836_p2, %p1835_p1 }
   0x8   :  { %p1838_p4 = pnand %p1837_p3, %p1831_p0 }
   0xa   :  { %1841 = shalt.err (!%p1838_p4)
}
   0xb   :  { %s1867_s15 = smov 256   ;;  %s1868_s16 = smov 16  }
   0xc   :  { %22 = dma.hbm_to_vmem [thread:$0]  %s2773_s0, 8192, %s17_s13, [#allocation6], %s1867_s15, %s1867_s15, %s1868_s16  }
   0xd   :  { %s1869_s19 = smov [#allocation7]  }
   0xe   :  { %s28_s20 = sshll.u32 %s1869_s19, 4  ;;  %s29_s20 = int_to_ptr.vmem [resolvable:$true] %s28_s20 }
   0xf   :  { %s1850_s21 = scalar_lea.vmem %s29_s20, 4096  ;;  %p1855_p6 = scmp.lt.s32.totalorder %s29_s20, %s29_s20 }
  0x10   :  { %p1851_p5 = scmp.ne.s32.totalorder %s29_s20, %s1850_s21  ;;  %p1856_p7 = scmp.lt.s32.totalorder %s1850_s21, %s1850_s21 }
  0x12   :  { %p1857_p8 = por %p1856_p7, %p1855_p6 }
  0x14   :  { %p1858_p9 = pnand %p1857_p8, %p1851_p5 }
  0x16   :  { %1861 = shalt.err (!%p1858_p9)
}
  0x17   :  { %s1870_s22 = smov 128   ;;  %s1871_s23 = smov 8  }
  0x18   :  { %34 = dma.hbm_to_vmem [thread:$0]  %s2774_s1, 4096, %s29_s20, [#allocation8], %s1870_s22, %s1870_s22, %s1871_s23  }
  0x19   :  { %1862 = dma.done.wait [#allocation6], 8192  }
  0x1a   :  { %1863 = vsyncadd [#allocation6], 4294959104 }
  0x1b   :  { %1864 = dma.done.wait [#allocation8], 4096  }
  0x1c   :  { %1865 = vsyncadd [#allocation8], 4294963200  ;;  %v1754_v0 = vld [vmem:[#allocation7 + $0x74] ss:$8 sps:$4 sm:$0xff]   ;;  %v1756_v1 = vld [vmem:[#allocation7 + $0x70] ss:$8 sps:$4 sm:$0xff]  }
  0x1d   :  { %536 = vmatprep.subr.bf16.mxu0 %v1754_v0  ;;  %1715 = vmatprep.subr.bf16.mxu1 %v1754_v0  ;;  %v1757_v2 = vld [vmem:[#allocation7 + $0x64] ss:$8 sps:$4 sm:$0xff]   ;;  %v1759_v3 = vld [vmem:[#allocation7 + $0x60] ss:$8 sps:$4 sm:$0xff]   ;;  %v1760_v4 = vld [vmem:[#allocation7 + $0x54] ss:$8 sps:$4 sm:$0xff]  }
  0x1e   :  { %537 = vmatpush1.bf16.msra.mxu0 %v1756_v1  ;;  %1731 = vmatpush1.bf16.msra.mxu1 %v1756_v1  ;;  %v1762_v5 = vld [vmem:[#allocation7 + $0x50] ss:$8 sps:$4 sm:$0xff]   ;;  %v1763_v6 = vld [vmem:[#allocation7 + $0x44] ss:$8 sps:$4 sm:$0xff]   ;;  %v1765_v7 = vld [vmem:[#allocation7 + $0x40] ss:$8 sps:$4 sm:$0xff]  }
  0x1f   :  { %538 = vmatprep.subr.bf16.mxu0 %v1757_v2  ;;  %1716 = vmatprep.subr.bf16.mxu1 %v1757_v2  ;;  %v1766_v8 = vld [vmem:[#allocation7 + $0x34] ss:$8 sps:$4 sm:$0xff]   ;;  %v1768_v9 = vld [vmem:[#allocation7 + $0x30] ss:$8 sps:$4 sm:$0xff]   ;;  %v1769_v10 = vld [vmem:[#allocation7 + $0x24] ss:$8 sps:$4 sm:$0xff]  }
  0x20   :  { %v1771_v11 = vld [vmem:[#allocation7 + $0x20] ss:$8 sps:$4 sm:$0xff]   ;;  %v1772_v12 = vld [vmem:[#allocation7 + $0x14] ss:$8 sps:$4 sm:$0xff]   ;;  %v1774_v19 = vld [vmem:[#allocation7 + $0x10] ss:$8 sps:$4 sm:$0xff]  }
  0x21   :  { %v1899_v13 = vld [vmem:[#allocation5 + $0x8] sm:$0xff]  ;;  %v1901_v14 = vld [vmem:[#allocation5 + $0x18] sm:$0xff]  ;;  %v1909_v18 = vld [vmem:[#allocation5] sm:$0xff]  ;;  %vm47_vm0 = vcmask 7168  }
  0x22   :  { %539 = vmatpush1.bf16.msra.mxu0 %v1759_v3  ;;  %1732 = vmatpush1.bf16.msra.mxu1 %v1759_v3  ;;  %v313_v15 = vpack.c.bf16 %v1901_v14, %v1899_v13  ;;  %v1905_v16 = vld [vmem:[#allocation5 + $0x108] sm:$0xff]  ;;  %v1907_v17 = vld [vmem:[#allocation5 + $0x118] sm:$0xff]  ;;  %v961_v21 = vadd.f32 %v1899_v13, %v1909_v18  ;;  %v1915_v23 = vld [vmem:[#allocation5 + $0x10] sm:$0xff] }
  0x23   :  { %540 = vmatprep.subr.bf16.mxu0 %v1760_v4  ;;  %1717 = vmatprep.subr.bf16.mxu1 %v1760_v4  ;;  %v329_v20 = vpack.c.bf16 %v1907_v17, %v1905_v16  ;;  %v1775_v22 = vld [vmem:[#allocation7 + $0x4] ss:$8 sps:$4 sm:$0xff]   ;;  %v964_v27 = vadd.f32 %v1901_v14, %v1915_v23  ;;  %v1777_v28 = vld [vmem:[#allocation7] ss:$8 sps:$4 sm:$0xff]   ;;  %v1778_v29 = vld [vmem:[#allocation7 + $0xf4] ss:$8 sps:$4 sm:$0xff]  }
  0x24   :  { %568 = vmatprep.mubr.bf16.mxu0 %v313_v15  ;;  %v1917_v24 = vld [vmem:[#allocation5 + $0x28] sm:$0xff]  ;;  %v1919_v25 = vld [vmem:[#allocation5 + $0x20] sm:$0xff]  ;;  %962 = vadd.xlane.f32.xlu0 %v961_v21  ;;  %v1925_v30 = vld [vmem:[#allocation5 + $0x38] sm:$0xff] }
  0x25   :  { %648 = vmatprep.mubr.bf16.mxu1 %v329_v20  ;;  %v967_v26 = vadd.f32 %v1917_v24, %v1919_v25  ;;  %v1927_v31 = vld [vmem:[#allocation5 + $0x30] sm:$0xff]  ;;  %v1929_v32 = vld [vmem:[#allocation5 + $0x48] sm:$0xff]  ;;  %v1931_v33 = vld [vmem:[#allocation5 + $0x40] sm:$0xff] }
  0x26   :  { %541 = vmatpush1.bf16.msra.mxu0 %v1762_v5  ;;  %1733 = vmatpush1.bf16.msra.mxu1 %v1762_v5  ;;  %v970_v34 = vadd.f32 %v1925_v30, %v1927_v31  ;;  %v973_v35 = vadd.f32 %v1929_v32, %v1931_v33  ;;  %v1780_v36 = vld [vmem:[#allocation7 + $0xf0] ss:$8 sps:$4 sm:$0xff]   ;;  %v1781_v37 = vld [vmem:[#allocation7 + $0xe4] ss:$8 sps:$4 sm:$0xff]   ;;  %v1783_v44 = vld [vmem:[#allocation7 + $0xe0] ss:$8 sps:$4 sm:$0xff]  }
  0x27   :  { %542 = vmatprep.subr.bf16.mxu0 %v1763_v6  ;;  %1718 = vmatprep.subr.bf16.mxu1 %v1763_v6  ;;  %v1937_v38 = vld [vmem:[#allocation5 + $0x58] sm:$0xff]  ;;  %v1939_v39 = vld [vmem:[#allocation5 + $0x50] sm:$0xff]  ;;  %v1941_v40 = vld [vmem:[#allocation5 + $0x68] sm:$0xff] }
  0x28   :  { %968 = vadd.xlane.f32.xlu1 %v967_v26  ;;  %965 = vadd.xlane.f32.xlu0 %v964_v27  ;;  %v1943_v41 = vld [vmem:[#allocation5 + $0x60] sm:$0xff]  ;;  %v976_v42 = vadd.f32 %v1937_v38, %v1939_v39  ;;  %v1784_v45 = vld [vmem:[#allocation7 + $0xd4] ss:$8 sps:$4 sm:$0xff]   ;;  %v1953_v48 = vld [vmem:[#allocation5 + $0x88] sm:$0xff] }
  0x29   :  { %v979_v43 = vadd.f32 %v1941_v40, %v1943_v41  ;;  %v1949_v46 = vld [vmem:[#allocation5 + $0x78] sm:$0xff]  ;;  %v1951_v47 = vld [vmem:[#allocation5 + $0x70] sm:$0xff]  ;;  %v1955_v49 = vld [vmem:[#allocation5 + $0x80] sm:$0xff] }
  0x2a   :  { %543 = vmatpush1.bf16.msra.mxu0 %v1765_v7  ;;  %1734 = vmatpush1.bf16.msra.mxu1 %v1765_v7  ;;  %v982_v50 = vadd.f32 %v1949_v46, %v1951_v47  ;;  %v985_v51 = vadd.f32 %v1953_v48, %v1955_v49  ;;  %v1786_v52 = vld [vmem:[#allocation7 + $0xd0] ss:$8 sps:$4 sm:$0xff]   ;;  %v1787_v53 = vld [vmem:[#allocation7 + $0xc4] ss:$8 sps:$4 sm:$0xff]   ;;  %v1789_v60 = vld [vmem:[#allocation7 + $0xc0] ss:$8 sps:$4 sm:$0xff]  }
  0x2b   :  { %544 = vmatprep.subr.bf16.mxu0 %v1766_v8  ;;  %1719 = vmatprep.subr.bf16.mxu1 %v1766_v8  ;;  %v1961_v54 = vld [vmem:[#allocation5 + $0x98] sm:$0xff]  ;;  %v1963_v55 = vld [vmem:[#allocation5 + $0x90] sm:$0xff]  ;;  %v1965_v56 = vld [vmem:[#allocation5 + $0xa8] sm:$0xff] }
  0x2c   :  { %971 = vadd.xlane.f32.xlu1 %v970_v34  ;;  %974 = vadd.xlane.f32.xlu0 %v973_v35  ;;  %v1967_v57 = vld [vmem:[#allocation5 + $0xa0] sm:$0xff]  ;;  %v988_v58 = vadd.f32 %v1961_v54, %v1963_v55  ;;  %v1790_v61 = vld [vmem:[#allocation7 + $0xb4] ss:$8 sps:$4 sm:$0xff]   ;;  %v1977_v0 = vld [vmem:[#allocation5 + $0xc8] sm:$0xff] }
  0x2d   :  { %v991_v59 = vadd.f32 %v1965_v56, %v1967_v57  ;;  %v1973_v62 = vld [vmem:[#allocation5 + $0xb8] sm:$0xff]  ;;  %v1975_v63 = vld [vmem:[#allocation5 + $0xb0] sm:$0xff]  ;;  %v1979_v1 = vld [vmem:[#allocation5 + $0xc0] sm:$0xff] }
  0x2e   :  { %545 = vmatpush1.bf16.msra.mxu0 %v1768_v9  ;;  %1735 = vmatpush1.bf16.msra.mxu1 %v1768_v9  ;;  %v994_v2 = vadd.f32 %v1973_v62, %v1975_v63  ;;  %v997_v3 = vadd.f32 %v1977_v0, %v1979_v1  ;;  %v1792_v4 = vld [vmem:[#allocation7 + $0xb0] ss:$8 sps:$4 sm:$0xff]   ;;  %v1793_v5 = vld [vmem:[#allocation7 + $0xa4] ss:$8 sps:$4 sm:$0xff]   ;;  %v1796_v15 = vld [vmem:[#allocation7 + $0x94] ss:$8 sps:$4 sm:$0xff]  }
  0x2f   :  { %546 = vmatprep.subr.bf16.mxu0 %v1769_v10  ;;  %1720 = vmatprep.subr.bf16.mxu1 %v1769_v10  ;;  %v1985_v6 = vld [vmem:[#allocation5 + $0xd8] sm:$0xff]  ;;  %v1987_v7 = vld [vmem:[#allocation5 + $0xd0] sm:$0xff]  ;;  %v1989_v8 = vld [vmem:[#allocation5 + $0xe8] sm:$0xff] }
  0x30   :  { %977 = vadd.xlane.f32.xlu1 %v976_v42  ;;  %980 = vadd.xlane.f32.xlu0 %v979_v43  ;;  %v1991_v9 = vld [vmem:[#allocation5 + $0xe0] sm:$0xff]  ;;  %v1000_v10 = vadd.f32 %v1985_v6, %v1987_v7  ;;  %v1999_v20 = vld [vmem:[#allocation5 + $0xf0] sm:$0xff]  ;;  %v2009_v34 = vld [vmem:[#allocation5 + $0x128] sm:$0xff] }
  0x31   :  { %v2001_v21 = vld [vmem:[#allocation5 + $0x100] sm:$0xff]  ;;  %v1798_v27 = vld [vmem:[#allocation7 + $0x90] ss:$8 sps:$4 sm:$0xff]  }
  0x32   :  { %547 = vmatpush1.bf16.msra.mxu0 %v1771_v11  ;;  %1736 = vmatpush1.bf16.msra.mxu1 %v1771_v11  ;;  %v1003_v11 = vadd.f32 %v1989_v8, %v1991_v9  ;;  %v1009_v26 = vadd.f32 %v1905_v16, %v2001_v21  ;;  %v2011_v35 = vld [vmem:[#allocation5 + $0x120] sm:$0xff]  ;;  %v2017_v43 = vld [vmem:[#allocation5 + $0x138] sm:$0xff] }
  0x33   :  { %548 = vmatprep.subr.bf16.mxu0 %v1772_v12  ;;  %1721 = vmatprep.subr.bf16.mxu1 %v1772_v12  ;;  %v1795_v12 = vld [vmem:[#allocation7 + $0xa0] ss:$8 sps:$4 sm:$0xff]  }
  0x34   :  { %983 = vadd.xlane.f32.xlu1 %v982_v50  ;;  %986 = vadd.xlane.f32.xlu0 %v985_v51  ;;  %v1801_v42 = vld [vmem:[#allocation7 + $0x80] ss:$8 sps:$4 sm:$0xff]   ;;  %v312_v50 = vpack.c.bf16 %v1915_v23, %v1909_v18 }
  0x36   :  { %549 = vmatpush1.bf16.msra.mxu0 %v1774_v19  ;;  %1737 = vmatpush1.bf16.msra.mxu1 %v1774_v19  ;;  %v1997_v19 = vld [vmem:[#allocation5 + $0xf8] sm:$0xff] }
  0x37   :  { %550 = vmatprep.subr.bf16.mxu0 %v1775_v22  ;;  %1722 = vmatprep.subr.bf16.mxu1 %v1775_v22  ;;  %v1006_v22 = vadd.f32 %v1997_v19, %v1999_v20 }
  0x38   :  { %989 = vadd.xlane.f32.xlu1 %v988_v58  ;;  %992 = vadd.xlane.f32.xlu0 %v991_v59  ;;  %v2031_v58 = vld [vmem:[#allocation5 + $0x148] sm:$0xff]  ;;  %v2033_v59 = vld [vmem:[#allocation5 + $0x140] sm:$0xff] }
  0x3a   :  { %551 = vmatpush1.bf16.msra.mxu0 %v1777_v28  ;;  %1738 = vmatpush1.bf16.msra.mxu1 %v1777_v28  ;;  %v1799_v28 = vld [vmem:[#allocation7 + $0x84] ss:$8 sps:$4 sm:$0xff]  }
  0x3b   :  { %552 = vmatprep.subr.bf16.mxu0 %v1778_v29  ;;  %1723 = vmatprep.subr.bf16.mxu1 %v1778_v29  ;;  %v2007_v29 = vld [vmem:[#allocation5 + $0x110] sm:$0xff] }
  0x3c   :  { %995 = vadd.xlane.f32.xlu1 %v994_v2  ;;  %998 = vadd.xlane.f32.xlu0 %v997_v3  ;;  %v328_v51 = vpack.c.bf16 %v2007_v29, %v2001_v21  ;;  %v1021_v2 = vadd.f32 %v2031_v58, %v2033_v59 }
  0x3e   :  { %553 = vmatpush2.bf16.msra.mxu0 %v1780_v36  ;;  %1739 = vmatpush2.bf16.msra.mxu1 %v1780_v36  ;;  %v1012_v36 = vadd.f32 %v1907_v17, %v2007_v29 }
  0x3f   :  { %554 = vmatprep.subr.bf16.mxu0 %v1781_v37  ;;  %1724 = vmatprep.subr.bf16.mxu1 %v1781_v37  ;;  %v1015_v37 = vadd.f32 %v2009_v34, %v2011_v35 }
  0x40   :  { %1001 = vadd.xlane.f32.xlu1 %v1000_v10  ;;  %1004 = vadd.xlane.f32.xlu0 %v1003_v11  ;;  %v2047_v10 = vld [vmem:[#allocation5 + $0x178] sm:$0xff]  ;;  %v2049_v11 = vld [vmem:[#allocation5 + $0x170] sm:$0xff] }
  0x42   :  { %555 = vmatpush2.bf16.msra.mxu0 %v1783_v44  ;;  %1740 = vmatpush2.bf16.msra.mxu1 %v1783_v44  ;;  %v2019_v44 = vld [vmem:[#allocation5 + $0x130] sm:$0xff] }
  0x43   :  { %556 = vmatprep.subr.bf16.mxu0 %v1784_v45  ;;  %1725 = vmatprep.subr.bf16.mxu1 %v1784_v45  ;;  %v1018_v45 = vadd.f32 %v2017_v43, %v2019_v44 }
  0x44   :  { %1007 = vadd.xlane.f32.xlu1 %v1006_v22  ;;  %1010 = vadd.xlane.f32.xlu0 %v1009_v26  ;;  %v314_v22 = vpack.c.bf16 %v1927_v31, %v1919_v25  ;;  %v330_v26 = vpack.c.bf16 %v2019_v44, %v2011_v35 }
  0x46   :  { %557 = vmatpush2.bf16.msra.mxu0 %v1786_v52  ;;  %1741 = vmatpush2.bf16.msra.mxu1 %v1786_v52  ;;  %v315_v52 = vpack.c.bf16 %v1925_v30, %v1917_v24 }
  0x47   :  { %558 = vmatprep.subr.bf16.mxu0 %v1787_v53  ;;  %1726 = vmatprep.subr.bf16.mxu1 %v1787_v53  ;;  %v331_v53 = vpack.c.bf16 %v2017_v43, %v2009_v34 }
  0x48   :  { %1013 = vadd.xlane.f32.xlu1 %v1012_v36  ;;  %1016 = vadd.xlane.f32.xlu0 %v1015_v37  ;;  %v2063_v36 = vld [vmem:[#allocation5 + $0x188] sm:$0xff]  ;;  %v2065_v37 = vld [vmem:[#allocation5 + $0x180] sm:$0xff] }
  0x4a   :  { %559 = vmatpush2.bf16.msra.mxu0 %v1789_v60  ;;  %1742 = vmatpush2.bf16.msra.mxu1 %v1789_v60  ;;  %v2035_v60 = vld [vmem:[#allocation5 + $0x158] sm:$0xff] }
  0x4b   :  { %560 = vmatprep.subr.bf16.mxu0 %v1790_v61  ;;  %1727 = vmatprep.subr.bf16.mxu1 %v1790_v61  ;;  %v2037_v61 = vld [vmem:[#allocation5 + $0x150] sm:$0xff] }
  0x4c   :  { %1019 = vadd.xlane.f32.xlu1 %v1018_v45  ;;  %v1024_v3 = vadd.f32 %v2035_v60, %v2037_v61  ;;  %1022 = vadd.xlane.f32.xlu0 %v1021_v2  ;;  %v2069_v45 = vld [vmem:[#allocation5 + $0x190] sm:$0xff] }
  0x4e   :  { %561 = vmatpush2.bf16.msra.mxu0 %v1792_v4  ;;  %1743 = vmatpush2.bf16.msra.mxu1 %v1792_v4  ;;  %v2043_v4 = vld [vmem:[#allocation5 + $0x168] sm:$0xff] }
  0x4f   :  { %562 = vmatprep.subr.bf16.mxu0 %v1793_v5  ;;  %1728 = vmatprep.subr.bf16.mxu1 %v1793_v5  ;;  %v2045_v5 = vld [vmem:[#allocation5 + $0x160] sm:$0xff] }
  0x50   :  { %1025 = vadd.xlane.f32.xlu1 %v1024_v3  ;;  %v316_v3 = vpack.c.bf16 %v1939_v39, %v1931_v33 }
  0x52   :  { %563 = vmatpush2.bf16.msra.mxu0 %v1795_v12  ;;  %1744 = vmatpush2.bf16.msra.mxu1 %v1795_v12  ;;  %v1027_v12 = vadd.f32 %v2043_v4, %v2045_v5 }
  0x53   :  { %564 = vmatprep.subr.bf16.mxu0 %v1796_v15  ;;  %1729 = vmatprep.subr.bf16.mxu1 %v1796_v15  ;;  %v1030_v15 = vadd.f32 %v2047_v10, %v2049_v11 }
  0x54   :  { %1028 = vadd.xlane.f32.xlu0 %v1027_v12  ;;  %v332_v12 = vpack.c.bf16 %v2037_v61, %v2033_v59 }
  0x55   :  { %1031 = vadd.xlane.f32.xlu1 %v1030_v15  ;;  %v319_v15 = vpack.c.bf16 %v1949_v46, %v1941_v40  ;;  %v2097_v46 = vld [vmem:[#allocation5 + $0x1b8] sm:$0xff] }
  0x56   :  { %565 = vmatpush2.bf16.msra.mxu0 %v1798_v27  ;;  %1745 = vmatpush2.bf16.msra.mxu1 %v1798_v27  ;;  %v317_v27 = vpack.c.bf16 %v1937_v38, %v1929_v32 }
  0x57   :  { %566 = vmatprep.subr.bf16.mxu0 %v1799_v28  ;;  %1730 = vmatprep.subr.bf16.mxu1 %v1799_v28  ;;  %v333_v28 = vpack.c.bf16 %v2035_v60, %v2031_v58 }
  0x5a   :  { %567 = vmatpush2.bf16.msra.mxu0 %v1801_v42  ;;  %1746 = vmatpush2.bf16.msra.mxu1 %v1801_v42  ;;  %v2067_v42 = vld [vmem:[#allocation5 + $0x198] sm:$0xff] }
  0x5b   :  { %v337_v40 = vpack.c.bf16 %v2067_v42, %v2063_v36 }
  0x5d   :  { %569 = vmatmul.mubr.bf16.vlgmr.msra.gmra.mxu0 %v312_v50  ;;  %649 = vmatmul.mubr.bf16.vlgmr.msra.gmra.mxu1 %v328_v51  ;;  %v1033_v50 = vadd.f32 %v2063_v36, %v2065_v37  ;;  %v1036_v51 = vadd.f32 %v2067_v42, %v2069_v45 }
  0x5e   :  { %578 = vmatprep.mubr.bf16.mxu0 %v315_v52  ;;  %658 = vmatprep.mubr.bf16.mxu1 %v331_v53  ;;  %v2075_v52 = vld [vmem:[#allocation5 + $0x1a8] sm:$0xff]  ;;  %v2077_v53 = vld [vmem:[#allocation5 + $0x1a0] sm:$0xff] }
  0x5f   :  { %1034 = vadd.xlane.f32.xlu0 %v1033_v50  ;;  %v1039_v2 = vadd.f32 %v2075_v52, %v2077_v53  ;;  %1037 = vadd.xlane.f32.xlu1 %v1036_v51  ;;  %v320_v50 = vpack.c.bf16 %v1963_v55, %v1955_v49  ;;  %v2109_v51 = vld [vmem:[#allocation5 + $0x1c8] sm:$0xff]  ;;  %v322_v49 = vpack.c.bf16 %v1975_v63, %v1967_v57  ;;  %v2127_v57 = vld [vmem:[#allocation5 + $0x1f8] sm:$0xff] }
  0x60   :  { %v324_v63 = vpack.c.bf16 %v1987_v7, %v1979_v1  ;;  %v326_v1 = vpack.c.bf16 %v1999_v20, %v1991_v9  ;;  %v1872_v20 = vmov 0.0  }
  0x61   :  { %48 = vst.msk [vmem:[#allocation3] sm:$0xff] %vm47_vm0, %v1872_v20  ;;  %49 = vst.msk [vmem:[#allocation3 + $0x8] sm:$0xff] %vm47_vm0, %v1872_v20 }
  0x62   :  { %50 = vst.msk [vmem:[#allocation3 + $0x10] sm:$0xff] %vm47_vm0, %v1872_v20  ;;  %51 = vst.msk [vmem:[#allocation3 + $0x18] sm:$0xff] %vm47_vm0, %v1872_v20 }
  0x63   :  { %1040 = vadd.xlane.f32.xlu0 %v1039_v2  ;;  %v2111_v2 = vld [vmem:[#allocation5 + $0x1d8] sm:$0xff]  ;;  %52 = vst.msk [vmem:[#allocation3 + $0x20] sm:$0xff] %vm47_vm0, %v1872_v20  ;;  %53 = vst.msk [vmem:[#allocation3 + $0x28] sm:$0xff] %vm47_vm0, %v1872_v20 }
  0x64   :  { %54 = vst.msk [vmem:[#allocation3 + $0x30] sm:$0xff] %vm47_vm0, %v1872_v20  ;;  %55 = vst.msk [vmem:[#allocation3 + $0x38] sm:$0xff] %vm47_vm0, %v1872_v20 }
  0x65   :  { %579 = vmatmul.mubr.bf16.gmra.mxu0 %v314_v22  ;;  %659 = vmatmul.mubr.bf16.gmra.mxu1 %v330_v26  ;;  %v335_v22 = vpack.c.bf16 %v2047_v10, %v2043_v4  ;;  %v318_v26 = vpack.c.bf16 %v1951_v47, %v1943_v41  ;;  %v336_v41 = vpack.c.bf16 %v2069_v45, %v2065_v37 }
  0x66   :  { %588 = vmatprep.mubr.bf16.mxu0 %v317_v27  ;;  %668 = vmatprep.mubr.bf16.mxu1 %v333_v28  ;;  %v334_v27 = vpack.c.bf16 %v2049_v11, %v2045_v5  ;;  %v321_v28 = vpack.c.bf16 %v1961_v54, %v1953_v48  ;;  %v323_v47 = vpack.c.bf16 %v1973_v62, %v1965_v56  ;;  %v2107_v54 = vld [vmem:[#allocation5 + $0x1b0] sm:$0xff] }
  0x67   :  { %v339_v48 = vpack.c.bf16 %v2097_v46, %v2075_v52  ;;  %v338_v55 = vpack.c.bf16 %v2107_v54, %v2077_v53  ;;  %v325_v56 = vpack.c.bf16 %v1985_v6, %v1977_v0  ;;  %v341_v62 = vpack.c.bf16 %v2111_v2, %v2109_v51  ;;  %56 = vst.msk [vmem:[#allocation3 + $0x40] sm:$0xff] %vm47_vm0, %v1872_v20 }
  0x68   :  { %v327_v6 = vpack.c.bf16 %v1997_v19, %v1989_v8  ;;  %v1042_v8 = vadd.f32 %v2097_v46, %v2107_v54  ;;  %57 = vst.msk [vmem:[#allocation3 + $0x48] sm:$0xff] %vm47_vm0, %v1872_v20  ;;  %58 = vst.msk [vmem:[#allocation3 + $0x50] sm:$0xff] %vm47_vm0, %v1872_v20 }
  0x69   :  { %59 = vst.msk [vmem:[#allocation3 + $0x58] sm:$0xff] %vm47_vm0, %v1872_v20  ;;  %60 = vst.msk [vmem:[#allocation3 + $0x60] sm:$0xff] %vm47_vm0, %v1872_v20 }
  0x6a   :  { %1043 = vadd.xlane.f32.xlu1 %v1042_v8  ;;  %61 = vst.msk [vmem:[#allocation3 + $0x68] sm:$0xff] %vm47_vm0, %v1872_v20  ;;  %62 = vst.msk [vmem:[#allocation3 + $0x70] sm:$0xff] %vm47_vm0, %v1872_v20 }
  0x6b   :  { %63 = vst.msk [vmem:[#allocation3 + $0x78] sm:$0xff] %vm47_vm0, %v1872_v20  ;;  %64 = vst.msk [vmem:[#allocation3 + $0x80] sm:$0xff] %vm47_vm0, %v1872_v20 }
  0x6c   :  { %65 = vst.msk [vmem:[#allocation3 + $0x88] sm:$0xff] %vm47_vm0, %v1872_v20  ;;  %66 = vst.msk [vmem:[#allocation3 + $0x90] sm:$0xff] %vm47_vm0, %v1872_v20 }
  0x6d   :  { %589 = vmatmul.mubr.bf16.gmra.mxu0 %v316_v3  ;;  %669 = vmatmul.mubr.bf16.gmra.mxu1 %v332_v12  ;;  %v2121_v3 = vld [vmem:[#allocation5 + $0x1c0] sm:$0xff]  ;;  %v2123_v12 = vld [vmem:[#allocation5 + $0x1d0] sm:$0xff]  ;;  %67 = vst.msk [vmem:[#allocation3 + $0x98] sm:$0xff] %vm47_vm0, %v1872_v20  ;;  %68 = vst.msk [vmem:[#allocation3 + $0xa0] sm:$0xff] %vm47_vm0, %v1872_v20 }
  0x6e   :  { %598 = vmatprep.mubr.bf16.mxu0 %v319_v15  ;;  %678 = vmatprep.mubr.bf16.mxu1 %v335_v22  ;;  %v2125_v15 = vld [vmem:[#allocation5 + $0x1e8] sm:$0xff]  ;;  %v340_v0 = vpack.c.bf16 %v2123_v12, %v2121_v3  ;;  %v1045_v19 = vadd.f32 %v2109_v51, %v2121_v3  ;;  %69 = vst.msk [vmem:[#allocation3 + $0xa8] sm:$0xff] %vm47_vm0, %v1872_v20  ;;  %70 = vst.msk [vmem:[#allocation3 + $0xb0] sm:$0xff] %vm47_vm0, %v1872_v20 }
  0x6f   :  { %v343_v22 = vpack.c.bf16 %v2127_v57, %v2125_v15  ;;  %71 = vst.msk [vmem:[#allocation3 + $0xb8] sm:$0xff] %vm47_vm0, %v1872_v20  ;;  %72 = vst.msk [vmem:[#allocation3 + $0xc0] sm:$0xff] %vm47_vm0, %v1872_v20 }
  0x70   :  { %1046 = vadd.xlane.f32.xlu0 %v1045_v19  ;;  %73 = vst.msk [vmem:[#allocation3 + $0xc8] sm:$0xff] %vm47_vm0, %v1872_v20  ;;  %74 = vst.msk [vmem:[#allocation3 + $0xd0] sm:$0xff] %vm47_vm0, %v1872_v20 }
  0x71   :  { %75 = vst.msk [vmem:[#allocation3 + $0xd8] sm:$0xff] %vm47_vm0, %v1872_v20  ;;  %76 = vst.msk [vmem:[#allocation3 + $0xe0] sm:$0xff] %vm47_vm0, %v1872_v20 }
  0x72   :  { %77 = vst.msk [vmem:[#allocation3 + $0xe8] sm:$0xff] %vm47_vm0, %v1872_v20  ;;  %78 = vst.msk [vmem:[#allocation3 + $0xf0] sm:$0xff] %vm47_vm0, %v1872_v20 }
  0x73   :  { %79 = vst.msk [vmem:[#allocation3 + $0xf8] sm:$0xff] %vm47_vm0, %v1872_v20  ;;  %80 = vst.msk [vmem:[#allocation4] sm:$0xff] %vm47_vm0, %v1872_v20 }
  0x74   :  { %81 = vst.msk [vmem:[#allocation4 + $0x8] sm:$0xff] %vm47_vm0, %v1872_v20  ;;  %82 = vst.msk [vmem:[#allocation4 + $0x10] sm:$0xff] %vm47_vm0, %v1872_v20 }
  0x75   :  { %599 = vmatmul.mubr.bf16.gmra.mxu0 %v318_v26  ;;  %679 = vmatmul.mubr.bf16.gmra.mxu1 %v334_v27  ;;  %v2137_v26 = vld [vmem:[#allocation5 + $0x1e0] sm:$0xff]  ;;  %v2139_v27 = vld [vmem:[#allocation5 + $0x1f0] sm:$0xff]  ;;  %83 = vst.msk [vmem:[#allocation4 + $0x18] sm:$0xff] %vm47_vm0, %v1872_v20  ;;  %84 = vst.msk [vmem:[#allocation4 + $0x20] sm:$0xff] %vm47_vm0, %v1872_v20 }
  0x76   :  { %608 = vmatprep.mubr.bf16.mxu0 %v321_v28  ;;  %688 = vmatprep.mubr.bf16.mxu1 %v337_v40  ;;  %v342_v7 = vpack.c.bf16 %v2139_v27, %v2137_v26  ;;  %v1048_v28 = vadd.f32 %v2111_v2, %v2123_v12  ;;  %85 = vst.msk [vmem:[#allocation4 + $0x28] sm:$0xff] %vm47_vm0, %v1872_v20  ;;  %86 = vst.msk [vmem:[#allocation4 + $0x30] sm:$0xff] %vm47_vm0, %v1872_v20 }
  0x77   :  { %87 = vst.msk [vmem:[#allocation4 + $0x38] sm:$0xff] %vm47_vm0, %v1872_v20  ;;  %88 = vst.msk [vmem:[#allocation4 + $0x40] sm:$0xff] %vm47_vm0, %v1872_v20 }
  0x78   :  { %1049 = vadd.xlane.f32.xlu1 %v1048_v28  ;;  %89 = vst.msk [vmem:[#allocation4 + $0x48] sm:$0xff] %vm47_vm0, %v1872_v20  ;;  %90 = vst.msk [vmem:[#allocation4 + $0x50] sm:$0xff] %vm47_vm0, %v1872_v20  ;;  %v935_v28 = vld [vmem:[#allocation3 + $0x30] sm:$0xff] }
  0x79   :  { %91 = vst.msk [vmem:[#allocation4 + $0x58] sm:$0xff] %vm47_vm0, %v1872_v20  ;;  %92 = vst.msk [vmem:[#allocation4 + $0x60] sm:$0xff] %vm47_vm0, %v1872_v20 }
  0x7a   :  { %93 = vst.msk [vmem:[#allocation4 + $0x68] sm:$0xff] %vm47_vm0, %v1872_v20  ;;  %94 = vst.msk [vmem:[#allocation4 + $0x70] sm:$0xff] %vm47_vm0, %v1872_v20 }
  0x7b   :  { %95 = vst.msk [vmem:[#allocation4 + $0x78] sm:$0xff] %vm47_vm0, %v1872_v20  ;;  %96 = vst.msk [vmem:[#allocation4 + $0x80] sm:$0xff] %vm47_vm0, %v1872_v20 }
  0x7c   :  { %97 = vst.msk [vmem:[#allocation4 + $0x88] sm:$0xff] %vm47_vm0, %v1872_v20  ;;  %98 = vst.msk [vmem:[#allocation4 + $0x90] sm:$0xff] %vm47_vm0, %v1872_v20 }
  0x7d   :  { %609 = vmatmul.mubr.bf16.gmra.mxu0 %v320_v50  ;;  %689 = vmatmul.mubr.bf16.gmra.mxu1 %v336_v41  ;;  %99 = vst.msk [vmem:[#allocation4 + $0x98] sm:$0xff] %vm47_vm0, %v1872_v20  ;;  %100 = vst.msk [vmem:[#allocation4 + $0xa0] sm:$0xff] %vm47_vm0, %v1872_v20 }
  0x7e   :  { %618 = vmatprep.mubr.bf16.mxu0 %v323_v47  ;;  %698 = vmatprep.mubr.bf16.mxu1 %v339_v48  ;;  %101 = vst.msk [vmem:[#allocation4 + $0xa8] sm:$0xff] %vm47_vm0, %v1872_v20  ;;  %102 = vst.msk [vmem:[#allocation4 + $0xb0] sm:$0xff] %vm47_vm0, %v1872_v20  ;;  %v929_v47 = vld [vmem:[#allocation3] sm:$0xff]  ;;  %v931_v48 = vld [vmem:[#allocation3 + $0x10] sm:$0xff] }
  0x7f   :  { %103 = vst.msk [vmem:[#allocation4 + $0xb8] sm:$0xff] %vm47_vm0, %v1872_v20  ;;  %104 = vst.msk [vmem:[#allocation4 + $0xc0] sm:$0xff] %vm47_vm0, %v1872_v20 }
  0x80   :  { %105 = vst.msk [vmem:[#allocation4 + $0xc8] sm:$0xff] %vm47_vm0, %v1872_v20  ;;  %106 = vst.msk [vmem:[#allocation4 + $0xd0] sm:$0xff] %vm47_vm0, %v1872_v20 }
  0x81   :  { %107 = vst.msk [vmem:[#allocation4 + $0xd8] sm:$0xff] %vm47_vm0, %v1872_v20  ;;  %108 = vst.msk [vmem:[#allocation4 + $0xe0] sm:$0xff] %vm47_vm0, %v1872_v20 }
  0x82   :  { %109 = vst.msk [vmem:[#allocation4 + $0xe8] sm:$0xff] %vm47_vm0, %v1872_v20  ;;  %110 = vst.msk [vmem:[#allocation4 + $0xf0] sm:$0xff] %vm47_vm0, %v1872_v20 }
  0x83   :  { %111 = vst.msk [vmem:[#allocation4 + $0xf8] sm:$0xff] %vm47_vm0, %v1872_v20  ;;  %v936_v20 = vld [vmem:[#allocation3 + $0x38] sm:$0xff] }
  0x85   :  { %619 = vmatmul.mubr.bf16.gmra.mxu0 %v322_v49  ;;  %699 = vmatmul.mubr.bf16.gmra.mxu1 %v338_v55  ;;  %v930_v49 = vld [vmem:[#allocation3 + $0x8] sm:$0xff] }
  0x86   :  { %628 = vmatprep.mubr.bf16.mxu0 %v325_v56  ;;  %708 = vmatprep.mubr.bf16.mxu1 %v341_v62 }
  0x8d   :  { %629 = vmatmul.mubr.bf16.gmra.mxu0 %v324_v63  ;;  %709 = vmatmul.mubr.bf16.gmra.mxu1 %v340_v0 }
  0x8e   :  { %638 = vmatprep.mubr.bf16.mxu0 %v327_v6  ;;  %718 = vmatprep.mubr.bf16.mxu1 %v343_v22  ;;  %v932_v6 = vld [vmem:[#allocation3 + $0x18] sm:$0xff]  ;;  %v933_v22 = vld [vmem:[#allocation3 + $0x20] sm:$0xff] }
  0x95   :  { %639 = vmatmul.mubr.bf16.gmra.mxu0 %v326_v1  ;;  %719 = vmatmul.mubr.bf16.gmra.mxu1 %v342_v7  ;;  %v934_v1 = vld [vmem:[#allocation3 + $0x28] sm:$0xff] }
  0xad   :  { %v2151_v40 = vpop.xlane.xlu0 %962 }
  0xae   :  { %v1057_v62 = vadd.f32 %v2151_v40, %v929_v47  ;;  %v937_v47 = vld [vmem:[#allocation3 + $0x40] sm:$0xff] }
  0xb0   :  { %1090 = vst.msk [vmem:[#allocation3] sm:$0xff] %vm47_vm0, %v1057_v62 }
  0xb1   :  { %v2153_v9 = vpop.xlane.xlu1 %968  ;;  %v966_v50 = vpop.xlane.xlu0 %965 }
  0xb2   :  { %v1059_v63 = vadd.f32 %v2153_v9, %v931_v48  ;;  %v1058_v0 = vadd.f32 %v966_v50, %v930_v49  ;;  %v938_v48 = vld [vmem:[#allocation3 + $0x48] sm:$0xff] }
  0xb4   :  { %1092 = vst.msk [vmem:[#allocation3 + $0x10] sm:$0xff] %vm47_vm0, %v1059_v63  ;;  %1091 = vst.msk [vmem:[#allocation3 + $0x8] sm:$0xff] %vm47_vm0, %v1058_v0  ;;  %v939_v63 = vld [vmem:[#allocation3 + $0x50] sm:$0xff]  ;;  %v940_v0 = vld [vmem:[#allocation3 + $0x58] sm:$0xff] }
  0xb5   :  { %v972_v41 = vpop.xlane.xlu1 %971  ;;  %v975_v55 = vpop.xlane.xlu0 %974 }
  0xb6   :  { %v1060_v7 = vadd.f32 %v972_v41, %v932_v6  ;;  %v1061_v8 = vadd.f32 %v975_v55, %v933_v22 }
  0xb7   :  { %v2293_v6 = vld [vmem:[#allocation3] sm:$0xff] }
  0xb8   :  { %1093 = vst.msk [vmem:[#allocation3 + $0x18] sm:$0xff] %vm47_vm0, %v1060_v7  ;;  %1094 = vst.msk [vmem:[#allocation3 + $0x20] sm:$0xff] %vm47_vm0, %v1061_v8 }
  0xb9   :  { %v978_v56 = vpop.xlane.xlu1 %977  ;;  %v981_v40 = vpop.xlane.xlu0 %980  ;;  %1477 = vst.msk [vmem:[%s2775_s2] sm:$0xff] %vm47_vm0, %v2293_v6 }
  0xba   :  { %v1062_v19 = vadd.f32 %v978_v56, %v934_v1  ;;  %v1063_v50 = vadd.f32 %v981_v40, %v935_v28 }
  0xbb   :  { %v2295_v22 = vld [vmem:[#allocation3 + $0x10] sm:$0xff]  ;;  %v2297_v1 = vld [vmem:[#allocation3 + $0x8] sm:$0xff] }
  0xbc   :  { %1095 = vst.msk [vmem:[#allocation3 + $0x28] sm:$0xff] %vm47_vm0, %v1062_v19  ;;  %1096 = vst.msk [vmem:[#allocation3 + $0x30] sm:$0xff] %vm47_vm0, %v1063_v50  ;;  %v941_v50 = vld [vmem:[#allocation3 + $0x60] sm:$0xff] }
  0xbd   :  { %v984_v9 = vpop.xlane.xlu1 %983  ;;  %v987_v49 = vpop.xlane.xlu0 %986  ;;  %2799 = vst [vmem:[#allocation11_spill] sm:$0xff] %v2295_v22  ;;  %1479 = vst.msk [vmem:[%s2775_s2 + $0x10] sm:$0xff] %vm47_vm0, %v2295_v22 }
  0xbe   :  { %v1064_v41 = vadd.f32 %v984_v9, %v936_v20  ;;  %v1065_v56 = vadd.f32 %v987_v49, %v937_v47  ;;  %1478 = vst.msk [vmem:[%s2775_s2 + $0x8] sm:$0xff] %vm47_vm0, %v2297_v1 }
  0xbf   :  { %v2314_v7 = vld [vmem:[#allocation3 + $0x18] sm:$0xff]  ;;  %v2316_v8 = vld [vmem:[#allocation3 + $0x20] sm:$0xff] }
  0xc0   :  { %1097 = vst.msk [vmem:[#allocation3 + $0x38] sm:$0xff] %vm47_vm0, %v1064_v41  ;;  %2800 = vst [vmem:[#allocation12_spill] sm:$0xff] %v2314_v7 }
  0xc1   :  { %v990_v55 = vpop.xlane.xlu1 %989  ;;  %2801 = vst [vmem:[#allocation13_spill] sm:$0xff] %v2316_v8  ;;  %1098 = vst.msk [vmem:[#allocation3 + $0x40] sm:$0xff] %vm47_vm0, %v1065_v56  ;;  %v993_v28 = vpop.xlane.xlu0 %992 }
  0xc2   :  { %v1066_v62 = vadd.f32 %v990_v55, %v938_v48  ;;  %1480 = vst.msk [vmem:[%s2775_s2 + $0x18] sm:$0xff] %vm47_vm0, %v2314_v7  ;;  %1481 = vst.msk [vmem:[%s2775_s2 + $0x20] sm:$0xff] %vm47_vm0, %v2316_v8  ;;  %v1067_v40 = vadd.f32 %v993_v28, %v939_v63  ;;  %v942_v48 = vld [vmem:[#allocation3 + $0x68] sm:$0xff]  ;;  %v943_v63 = vld [vmem:[#allocation3 + $0x70] sm:$0xff] }
  0xc3   :  { %v2318_v19 = vld [vmem:[#allocation3 + $0x28] sm:$0xff]  ;;  %v2337_v41 = vld [vmem:[#allocation3 + $0x30] sm:$0xff] }
  0xc4   :  { %2802 = vst [vmem:[#allocation14_spill] sm:$0xff] %v2318_v19  ;;  %1099 = vst.msk [vmem:[#allocation3 + $0x48] sm:$0xff] %vm47_vm0, %v1066_v62 }
  0xc5   :  { %1482 = vst.msk [vmem:[%s2775_s2 + $0x28] sm:$0xff] %vm47_vm0, %v2318_v19  ;;  %v996_v20 = vpop.xlane.xlu1 %995  ;;  %2803 = vst [vmem:[#allocation15_spill] sm:$0xff] %v2337_v41  ;;  %v999_v49 = vpop.xlane.xlu0 %998  ;;  %v955_v19 = vld [vmem:[#allocation3 + $0xd0] sm:$0xff] }
  0xc6   :  { %v1068_v9 = vadd.f32 %v996_v20, %v940_v0  ;;  %1483 = vst.msk [vmem:[%s2775_s2 + $0x30] sm:$0xff] %vm47_vm0, %v2337_v41  ;;  %1100 = vst.msk [vmem:[#allocation3 + $0x50] sm:$0xff] %vm47_vm0, %v1067_v40  ;;  %v1069_v56 = vadd.f32 %v999_v49, %v941_v50  ;;  %v944_v20 = vld [vmem:[#allocation3 + $0x78] sm:$0xff]  ;;  %v945_v49 = vld [vmem:[#allocation3 + $0x80] sm:$0xff] }
  0xc7   :  { %v2339_v47 = vld [vmem:[#allocation3 + $0x38] sm:$0xff]  ;;  %v954_v41 = vld [vmem:[#allocation3 + $0xc8] sm:$0xff] }
  0xc8   :  { %2804 = vst [vmem:[#allocation16_spill] sm:$0xff] %v2339_v47  ;;  %1484 = vst.msk [vmem:[%s2775_s2 + $0x38] sm:$0xff] %vm47_vm0, %v2339_v47  ;;  %v2353_v0 = vld [vmem:[#allocation3 + $0x40] sm:$0xff] }
  0xc9   :  { %1101 = vst.msk [vmem:[#allocation3 + $0x58] sm:$0xff] %vm47_vm0, %v1068_v9  ;;  %v1002_v55 = vpop.xlane.xlu1 %1001  ;;  %2805 = vst [vmem:[#allocation17_spill] sm:$0xff] %v2353_v0  ;;  %v1005_v40 = vpop.xlane.xlu0 %1004 }
  0xca   :  { %v1070_v62 = vadd.f32 %v1002_v55, %v942_v48  ;;  %1485 = vst.msk [vmem:[%s2775_s2 + $0x40] sm:$0xff] %vm47_vm0, %v2353_v0  ;;  %1102 = vst.msk [vmem:[#allocation3 + $0x60] sm:$0xff] %vm47_vm0, %v1069_v56  ;;  %v1071_v50 = vadd.f32 %v1005_v40, %v943_v63  ;;  %v946_v0 = vld [vmem:[#allocation3 + $0x88] sm:$0xff]  ;;  %v947_v40 = vld [vmem:[#allocation3 + $0x90] sm:$0xff] }
  0xcb   :  { %v2355_v28 = vld [vmem:[#allocation3 + $0x48] sm:$0xff] }
  0xcc   :  { %2806 = vst [vmem:[#allocation18_spill] sm:$0xff] %v2355_v28  ;;  %1486 = vst.msk [vmem:[%s2775_s2 + $0x48] sm:$0xff] %vm47_vm0, %v2355_v28 }
  0xcd   :  { %1103 = vst.msk [vmem:[#allocation3 + $0x68] sm:$0xff] %vm47_vm0, %v1070_v62  ;;  %v1008_v9 = vpop.xlane.xlu1 %1007  ;;  %v2369_v55 = vld [vmem:[#allocation3 + $0x50] sm:$0xff]  ;;  %1104 = vst.msk [vmem:[#allocation3 + $0x70] sm:$0xff] %vm47_vm0, %v1071_v50  ;;  %v1011_v56 = vpop.xlane.xlu0 %1010 }
  0xce   :  { %v1072_v48 = vadd.f32 %v1008_v9, %v944_v20  ;;  %2807 = vst [vmem:[#allocation19_spill] sm:$0xff] %v2369_v55  ;;  %1487 = vst.msk [vmem:[%s2775_s2 + $0x50] sm:$0xff] %vm47_vm0, %v2369_v55  ;;  %v1073_v63 = vadd.f32 %v1011_v56, %v945_v49  ;;  %v948_v55 = vld [vmem:[#allocation3 + $0x98] sm:$0xff]  ;;  %v949_v56 = vld [vmem:[#allocation3 + $0xa0] sm:$0xff] }
  0xd0   :  { %v2371_v47 = vld [vmem:[#allocation3 + $0x58] sm:$0xff]  ;;  %1105 = vst.msk [vmem:[#allocation3 + $0x78] sm:$0xff] %vm47_vm0, %v1072_v48  ;;  %1106 = vst.msk [vmem:[#allocation3 + $0x80] sm:$0xff] %vm47_vm0, %v1073_v63 }
  0xd1   :  { %2808 = vst [vmem:[#allocation20_spill] sm:$0xff] %v2371_v47  ;;  %1488 = vst.msk [vmem:[%s2775_s2 + $0x58] sm:$0xff] %vm47_vm0, %v2371_v47  ;;  %v1014_v62 = vpop.xlane.xlu1 %1013  ;;  %v2385_v9 = vld [vmem:[#allocation3 + $0x60] sm:$0xff] }
  0xd2   :  { %v1074_v20 = vadd.f32 %v1014_v62, %v946_v0  ;;  %2809 = vst [vmem:[#allocation21_spill] sm:$0xff] %v2385_v9  ;;  %1489 = vst.msk [vmem:[%s2775_s2 + $0x60] sm:$0xff] %vm47_vm0, %v2385_v9  ;;  %v1017_v0 = vpop.xlane.xlu0 %1016  ;;  %v950_v9 = vld [vmem:[#allocation3 + $0xa8] sm:$0xff] }
  0xd3   :  { %v1075_v48 = vadd.f32 %v1017_v0, %v947_v40  ;;  %v951_v0 = vld [vmem:[#allocation3 + $0xb0] sm:$0xff] }
  0xd4   :  { %v2387_v28 = vld [vmem:[#allocation3 + $0x68] sm:$0xff]  ;;  %1107 = vst.msk [vmem:[#allocation3 + $0x88] sm:$0xff] %vm47_vm0, %v1074_v20  ;;  %v2401_v62 = vld [vmem:[#allocation3 + $0x70] sm:$0xff] }
  0xd5   :  { %2810 = vst [vmem:[#allocation22_spill] sm:$0xff] %v2387_v28  ;;  %1490 = vst.msk [vmem:[%s2775_s2 + $0x68] sm:$0xff] %vm47_vm0, %v2387_v28  ;;  %v1020_v50 = vpop.xlane.xlu1 %1019 }
  0xd6   :  { %v1076_v49 = vadd.f32 %v1020_v50, %v948_v55  ;;  %2811 = vst [vmem:[#allocation23_spill] sm:$0xff] %v2401_v62  ;;  %1491 = vst.msk [vmem:[%s2775_s2 + $0x70] sm:$0xff] %vm47_vm0, %v2401_v62  ;;  %v1023_v55 = vpop.xlane.xlu0 %1022  ;;  %v952_v62 = vld [vmem:[#allocation3 + $0xb8] sm:$0xff] }
  0xd7   :  { %v2403_v47 = vld [vmem:[#allocation3 + $0x78] sm:$0xff]  ;;  %1108 = vst.msk [vmem:[#allocation3 + $0x90] sm:$0xff] %vm47_vm0, %v1075_v48  ;;  %v1077_v20 = vadd.f32 %v1023_v55, %v949_v56  ;;  %v2417_v50 = vld [vmem:[#allocation3 + $0x80] sm:$0xff] }
  0xd8   :  { %2812 = vst [vmem:[#allocation24_spill] sm:$0xff] %v2403_v47  ;;  %1492 = vst.msk [vmem:[%s2775_s2 + $0x78] sm:$0xff] %vm47_vm0, %v2403_v47  ;;  %v953_v55 = vld [vmem:[#allocation3 + $0xc0] sm:$0xff] }
  0xd9   :  { %1109 = vst.msk [vmem:[#allocation3 + $0x98] sm:$0xff] %vm47_vm0, %v1076_v49  ;;  %v1026_v63 = vpop.xlane.xlu1 %1025  ;;  %1493 = vst.msk [vmem:[%s2775_s2 + $0x80] sm:$0xff] %vm47_vm0, %v2417_v50 }
  0xda   :  { %v1078_v40 = vadd.f32 %v1026_v63, %v950_v9  ;;  %1110 = vst.msk [vmem:[#allocation3 + $0xa0] sm:$0xff] %vm47_vm0, %v1077_v20 }
  0xdb   :  { %v2419_v28 = vld [vmem:[#allocation3 + $0x88] sm:$0xff] }
  0xdc   :  { %2813 = vst [vmem:[#allocation25_spill] sm:$0xff] %v2419_v28  ;;  %1494 = vst.msk [vmem:[%s2775_s2 + $0x88] sm:$0xff] %vm47_vm0, %v2419_v28 }
  0xdd   :  { %1111 = vst.msk [vmem:[#allocation3 + $0xa8] sm:$0xff] %vm47_vm0, %v1078_v40  ;;  %v1029_v9 = vpop.xlane.xlu0 %1028 }
  0xde   :  { %v1032_v48 = vpop.xlane.xlu1 %1031  ;;  %v1079_v49 = vadd.f32 %v1029_v9, %v951_v0  ;;  %v2433_v63 = vld [vmem:[#allocation3 + $0x90] sm:$0xff] }
  0xdf   :  { %v1080_v56 = vadd.f32 %v1032_v48, %v952_v62  ;;  %2814 = vst [vmem:[#allocation26_spill] sm:$0xff] %v2433_v63  ;;  %1495 = vst.msk [vmem:[%s2775_s2 + $0x90] sm:$0xff] %vm47_vm0, %v2433_v63 }
  0xe0   :  { %v2435_v47 = vld [vmem:[#allocation3 + $0x98] sm:$0xff]  ;;  %1112 = vst.msk [vmem:[#allocation3 + $0xb0] sm:$0xff] %vm47_vm0, %v1079_v49 }
  0xe1   :  { %2815 = vst [vmem:[#allocation27_spill] sm:$0xff] %v2435_v47  ;;  %1496 = vst.msk [vmem:[%s2775_s2 + $0x98] sm:$0xff] %vm47_vm0, %v2435_v47  ;;  %v2449_v9 = vld [vmem:[#allocation3 + $0xa0] sm:$0xff] }
  0xe2   :  { %1113 = vst.msk [vmem:[#allocation3 + $0xb8] sm:$0xff] %vm47_vm0, %v1080_v56  ;;  %2816 = vst [vmem:[#allocation28_spill] sm:$0xff] %v2449_v9 }
  0xe3   :  { %1497 = vst.msk [vmem:[%s2775_s2 + $0xa0] sm:$0xff] %vm47_vm0, %v2449_v9 }
  0xe4   :  { %v2451_v48 = vld [vmem:[#allocation3 + $0xa8] sm:$0xff] }
  0xe5   :  { %2817 = vst [vmem:[#allocation29_spill] sm:$0xff] %v2451_v48  ;;  %1498 = vst.msk [vmem:[%s2775_s2 + $0xa8] sm:$0xff] %vm47_vm0, %v2451_v48 }
  0xe8   :  { %v1035_v62 = vpop.xlane.xlu0 %1034  ;;  %v1038_v20 = vpop.xlane.xlu1 %1037 }
  0xe9   :  { %v1081_v40 = vadd.f32 %v1035_v62, %v953_v55  ;;  %v1082_v0 = vadd.f32 %v1038_v20, %v954_v41  ;;  %v2465_v62 = vld [vmem:[#allocation3 + $0xb0] sm:$0xff]  ;;  %v2467_v20 = vld [vmem:[#allocation3 + $0xb8] sm:$0xff] }
  0xea   :  { %2818 = vst [vmem:[#allocation30_spill] sm:$0xff] %v2465_v62  ;;  %1499 = vst.msk [vmem:[%s2775_s2 + $0xb0] sm:$0xff] %vm47_vm0, %v2465_v62 }
  0xeb   :  { %1114 = vst.msk [vmem:[#allocation3 + $0xc0] sm:$0xff] %vm47_vm0, %v1081_v40  ;;  %1115 = vst.msk [vmem:[#allocation3 + $0xc8] sm:$0xff] %vm47_vm0, %v1082_v0 }
  0xec   :  { %v1041_v41 = vpop.xlane.xlu0 %1040  ;;  %1500 = vst.msk [vmem:[%s2775_s2 + $0xb8] sm:$0xff] %vm47_vm0, %v2467_v20 }
  0xed   :  { %v1083_v55 = vadd.f32 %v1041_v41, %v955_v19 }
  0xef   :  { %1116 = vst.msk [vmem:[#allocation3 + $0xd0] sm:$0xff] %vm47_vm0, %v1083_v55 }
  0xf2   :  { %v2484_v62 = vld [vmem:[#allocation3 + $0xc0] sm:$0xff]  ;;  %v2486_v63 = vld [vmem:[#allocation3 + $0xc8] sm:$0xff] }
  0xf3   :  { %2819 = vst [vmem:[#allocation31_spill] sm:$0xff] %v2486_v63  ;;  %1501 = vst.msk [vmem:[%s2775_s2 + $0xc0] sm:$0xff] %vm47_vm0, %v2484_v62 }
  0xf4   :  { %1502 = vst.msk [vmem:[%s2775_s2 + $0xc8] sm:$0xff] %vm47_vm0, %v2486_v63 }
 0x11d   :  { %v570_v49 = vpop.f32.mrf.mxu0  ;;  %v650_v56 = vpop.f32.mrf.mxu1 }
 0x11e   :  { %v1218_v19 = vmul.f32 %v570_v49, %v1909_v18  ;;  %v1250_v48 = vmul.f32 %v650_v56, %v2001_v21  ;;  %v2501_v56 = vld [vmem:[#allocation3 + $0xd0] sm:$0xff] }
 0x11f   :  { %v572_v8 = vpop.f32.mrf.mxu0  ;;  %v652_v9 = vpop.f32.mrf.mxu1  ;;  %2820 = vst [vmem:[#allocation32_spill] sm:$0xff] %v2501_v56  ;;  %1503 = vst.msk [vmem:[%s2775_s2 + $0xd0] sm:$0xff] %vm47_vm0, %v2501_v56 }
 0x120   :  { %v1219_v40 = vmul.f32 %v572_v8, %v1899_v13  ;;  %v1251_v47 = vmul.f32 %v652_v9, %v1905_v16  ;;  %v1047_v56 = vpop.xlane.xlu0 %1046 }
 0x121   :  { %v574_v0 = vpop.f32.mrf.mxu0  ;;  %v654_v41 = vpop.f32.mrf.mxu1 }
 0x122   :  { %v1282_v7 = vadd.f32 %v1219_v40, %v1218_v19  ;;  %v1220_v13 = vmul.f32 %v574_v0, %v1915_v23  ;;  %v1330_v9 = vadd.f32 %v1251_v47, %v1250_v48  ;;  %v1252_v23 = vmul.f32 %v654_v41, %v2007_v29 }
 0x123   :  { %v576_v22 = vpop.f32.mrf.mxu0  ;;  %v656_v28 = vpop.f32.mrf.mxu1 }
 0x124   :  { %v1221_v16 = vmul.f32 %v576_v22, %v1901_v14  ;;  %1283 = vadd.xlane.f32.xlu0 %v1282_v7  ;;  %v1253_v8 = vmul.f32 %v656_v28, %v1907_v17  ;;  %v956_v17 = vld [vmem:[#allocation3 + $0xd8] sm:$0xff]  ;;  %v957_v7 = vld [vmem:[#allocation3 + $0xe0] sm:$0xff] }
 0x125   :  { %v580_v18 = vpop.f32.mrf.mxu0  ;;  %v660_v21 = vpop.f32.mrf.mxu1 }
 0x126   :  { %v1285_v49 = vadd.f32 %v1221_v16, %v1220_v13  ;;  %v1222_v14 = vmul.f32 %v580_v18, %v1919_v25  ;;  %v1254_v48 = vmul.f32 %v660_v21, %v2011_v35  ;;  %v1333_v0 = vadd.f32 %v1253_v8, %v1252_v23  ;;  %v1044_v16 = vpop.xlane.xlu1 %1043 }
 0x127   :  { %v582_v55 = vpop.f32.mrf.mxu0  ;;  %v662_v19 = vpop.f32.mrf.mxu1  ;;  %v1084_v41 = vadd.f32 %v1044_v16, %v956_v17  ;;  %v1085_v25 = vadd.f32 %v1047_v56, %v957_v7 }
 0x128   :  { %v1223_v22 = vmul.f32 %v582_v55, %v1917_v24  ;;  %1331 = vadd.xlane.f32.xlu0 %v1330_v9  ;;  %1286 = vadd.xlane.f32.xlu1 %v1285_v49  ;;  %v1255_v40 = vmul.f32 %v662_v19, %v2009_v34  ;;  %v958_v9 = vld [vmem:[#allocation3 + $0xe8] sm:$0xff] }
 0x129   :  { %v584_v47 = vpop.f32.mrf.mxu0  ;;  %v664_v28 = vpop.f32.mrf.mxu1  ;;  %1117 = vst.msk [vmem:[#allocation3 + $0xd8] sm:$0xff] %vm47_vm0, %v1084_v41  ;;  %1118 = vst.msk [vmem:[#allocation3 + $0xe0] sm:$0xff] %vm47_vm0, %v1085_v25  ;;  %v1802_v41 = vld [vmem:[#allocation5 + $0x60] sm:$0xff] }
 0x12a   :  { %v1288_v13 = vadd.f32 %v1223_v22, %v1222_v14  ;;  %v1224_v24 = vmul.f32 %v584_v47, %v1927_v31  ;;  %v1336_v35 = vadd.f32 %v1255_v40, %v1254_v48  ;;  %v1050_v8 = vpop.xlane.xlu1 %1049  ;;  %v1256_v31 = vmul.f32 %v664_v28, %v2019_v44 }
 0x12b   :  { %v586_v63 = vpop.f32.mrf.mxu0  ;;  %v666_v29 = vpop.f32.mrf.mxu1  ;;  %v1086_v23 = vadd.f32 %v1050_v8, %v958_v9 }
 0x12c   :  { %v1225_v18 = vmul.f32 %v586_v63, %v1925_v30  ;;  %1334 = vadd.xlane.f32.xlu1 %v1333_v0  ;;  %1289 = vadd.xlane.f32.xlu0 %v1288_v13  ;;  %v1257_v34 = vmul.f32 %v666_v29, %v2017_v43 }
 0x12d   :  { %v590_v49 = vpop.f32.mrf.mxu0  ;;  %v670_v55 = vpop.f32.mrf.mxu1  ;;  %1119 = vst.msk [vmem:[#allocation3 + $0xe8] sm:$0xff] %vm47_vm0, %v1086_v23  ;;  %v1805_v23 = vld [vmem:[#allocation5 + $0x78] sm:$0xff] }
 0x12e   :  { %v1291_v21 = vadd.f32 %v1225_v18, %v1224_v24  ;;  %v1226_v30 = vmul.f32 %v590_v49, %v1931_v33  ;;  %v1258_v43 = vmul.f32 %v670_v55, %v2033_v59  ;;  %v1339_v7 = vadd.f32 %v1257_v34, %v1256_v31  ;;  %v1803_v24 = vld [vmem:[#allocation5 + $0x68] sm:$0xff] }
 0x12f   :  { %v592_v19 = vpop.f32.mrf.mxu0  ;;  %v672_v56 = vpop.f32.mrf.mxu1 }
 0x130   :  { %v1227_v63 = vmul.f32 %v592_v19, %v1929_v32  ;;  %1337 = vadd.xlane.f32.xlu0 %v1336_v35  ;;  %1292 = vadd.xlane.f32.xlu1 %v1291_v21  ;;  %v1259_v17 = vmul.f32 %v672_v56, %v2031_v58  ;;  %v2526_v32 = vld [vmem:[#allocation3 + $0xd8] sm:$0xff]  ;;  %v2528_v28 = vld [vmem:[#allocation3 + $0xe0] sm:$0xff]  ;;  %v1804_v19 = vld [vmem:[#allocation5 + $0x70] sm:$0xff] }
 0x131   :  { %v594_v14 = vpop.f32.mrf.mxu0  ;;  %v674_v22 = vpop.f32.mrf.mxu1  ;;  %1504 = vst.msk [vmem:[%s2775_s2 + $0xd8] sm:$0xff] %vm47_vm0, %v2526_v32  ;;  %1505 = vst.msk [vmem:[%s2775_s2 + $0xe0] sm:$0xff] %vm47_vm0, %v2528_v28 }
 0x132   :  { %v1294_v47 = vadd.f32 %v1227_v63, %v1226_v30  ;;  %v1228_v44 = vmul.f32 %v594_v14, %v1939_v39  ;;  %v1342_v39 = vadd.f32 %v1259_v17, %v1258_v43  ;;  %v1260_v29 = vmul.f32 %v674_v22, %v2037_v61 }
 0x133   :  { %v596_v48 = vpop.f32.mrf.mxu0  ;;  %v676_v40 = vpop.f32.mrf.mxu1 }
 0x134   :  { %v1229_v33 = vmul.f32 %v596_v48, %v1937_v38  ;;  %1340 = vadd.xlane.f32.xlu1 %v1339_v7  ;;  %1295 = vadd.xlane.f32.xlu0 %v1294_v47  ;;  %v1261_v38 = vmul.f32 %v676_v40, %v2035_v60  ;;  %v2542_v9 = vld [vmem:[#allocation3 + $0xe8] sm:$0xff]  ;;  %v1806_v7 = vld [vmem:[#allocation5 + $0x80] sm:$0xff] }
 0x135   :  { %v600_v0 = vpop.f32.mrf.mxu0  ;;  %v680_v13 = vpop.f32.mrf.mxu1  ;;  %1506 = vst.msk [vmem:[%s2775_s2 + $0xe8] sm:$0xff] %vm47_vm0, %v2542_v9  ;;  %v1807_v48 = vld [vmem:[#allocation5 + $0x88] sm:$0xff] }
 0x136   :  { %v1297_v58 = vadd.f32 %v1229_v33, %v1228_v44  ;;  %v1230_v25 = vmul.f32 %v1802_v41, %v600_v0  ;;  %v1262_v60 = vmul.f32 %v680_v13, %v2045_v5  ;;  %v1345_v34 = vadd.f32 %v1261_v38, %v1260_v29  ;;  %v1809_v29 = vld [vmem:[#allocation5 + $0x98] sm:$0xff] }
 0x137   :  { %v602_v59 = vpop.f32.mrf.mxu0  ;;  %v682_v16 = vpop.f32.mrf.mxu1 }
 0x138   :  { %v1231_v18 = vmul.f32 %v1803_v24, %v602_v59  ;;  %1343 = vadd.xlane.f32.xlu0 %v1342_v39  ;;  %1298 = vadd.xlane.f32.xlu1 %v1297_v58  ;;  %v1263_v61 = vmul.f32 %v682_v16, %v2043_v4  ;;  %v1808_v59 = vld [vmem:[#allocation5 + $0x90] sm:$0xff] }
 0x139   :  { %v604_v49 = vpop.f32.mrf.mxu0  ;;  %v684_v55 = vpop.f32.mrf.mxu1 }
 0x13a   :  { %v1300_v35 = vadd.f32 %v1231_v18, %v1230_v25  ;;  %v1232_v56 = vmul.f32 %v1804_v19, %v604_v49  ;;  %v1348_v22 = vadd.f32 %v1263_v61, %v1262_v60  ;;  %v1264_v4 = vmul.f32 %v684_v55, %v2049_v11  ;;  %v1810_v60 = vld [vmem:[#allocation5 + $0xa0] sm:$0xff] }
 0x13b   :  { %v606_v21 = vpop.f32.mrf.mxu0  ;;  %v686_v8 = vpop.f32.mrf.mxu1 }
 0x13c   :  { %v1233_v31 = vmul.f32 %v1805_v23, %v606_v21  ;;  %1346 = vadd.xlane.f32.xlu1 %v1345_v34  ;;  %1301 = vadd.xlane.f32.xlu0 %v1300_v35  ;;  %v1265_v14 = vmul.f32 %v686_v8, %v2047_v10  ;;  %v1811_v34 = vld [vmem:[#allocation5 + $0xa8] sm:$0xff] }
 0x13d   :  { %v610_v30 = vpop.f32.mrf.mxu0  ;;  %v690_v63 = vpop.f32.mrf.mxu1 }
 0x13e   :  { %v1303_v43 = vadd.f32 %v1233_v31, %v1232_v56  ;;  %v1234_v47 = vmul.f32 %v1806_v7, %v610_v30  ;;  %v1266_v0 = vmul.f32 %v690_v63, %v2065_v37  ;;  %v1351_v38 = vadd.f32 %v1265_v14, %v1264_v4  ;;  %v1812_v63 = vld [vmem:[#allocation5 + $0xb0] sm:$0xff] }
 0x13f   :  { %v612_v17 = vpop.f32.mrf.mxu0  ;;  %v692_v5 = vpop.f32.mrf.mxu1 }
 0x140   :  { %v1235_v40 = vmul.f32 %v1807_v48, %v612_v17  ;;  %1349 = vadd.xlane.f32.xlu0 %v1348_v22  ;;  %1304 = vadd.xlane.f32.xlu1 %v1303_v43  ;;  %v1267_v13 = vmul.f32 %v692_v5, %v2063_v36  ;;  %v1813_v22 = vld [vmem:[#allocation5 + $0xb8] sm:$0xff]  ;;  %v1814_v48 = vld [vmem:[#allocation5 + $0xc0] sm:$0xff] }
 0x141   :  { %v614_v44 = vpop.f32.mrf.mxu0  ;;  %v694_v33 = vpop.f32.mrf.mxu1 }
 0x142   :  { %v1306_v10 = vadd.f32 %v1235_v40, %v1234_v47  ;;  %v1236_v16 = vmul.f32 %v1808_v59, %v614_v44  ;;  %v1354_v18 = vadd.f32 %v1267_v13, %v1266_v0  ;;  %v1268_v36 = vmul.f32 %v694_v33, %v2069_v45  ;;  %v1815_v44 = vld [vmem:[#allocation5 + $0xc8] sm:$0xff] }
 0x143   :  { %v616_v39 = vpop.f32.mrf.mxu0  ;;  %v696_v58 = vpop.f32.mrf.mxu1 }
 0x144   :  { %v1237_v11 = vmul.f32 %v1809_v29, %v616_v39  ;;  %1352 = vadd.xlane.f32.xlu1 %v1351_v38  ;;  %1307 = vadd.xlane.f32.xlu0 %v1306_v10  ;;  %v1269_v24 = vmul.f32 %v696_v58, %v2067_v42 }
 0x145   :  { %v620_v41 = vpop.f32.mrf.mxu0  ;;  %v700_v25 = vpop.f32.mrf.mxu1 }
 0x146   :  { %v1309_v49 = vadd.f32 %v1237_v11, %v1236_v16  ;;  %v1238_v61 = vmul.f32 %v1810_v60, %v620_v41  ;;  %v1270_v19 = vmul.f32 %v700_v25, %v2077_v53  ;;  %v1357_v23 = vadd.f32 %v1269_v24, %v1268_v36  ;;  %v1816_v16 = vld [vmem:[#allocation5 + $0xd0] sm:$0xff]  ;;  %v1817_v11 = vld [vmem:[#allocation5 + $0xd8] sm:$0xff]  ;;  %v1819_v60 = vld [vmem:[#allocation5 + $0xe8] sm:$0xff] }
 0x147   :  { %v622_v55 = vpop.f32.mrf.mxu0  ;;  %v702_v37 = vpop.f32.mrf.mxu1 }
 0x148   :  { %v1239_v35 = vmul.f32 %v1811_v34, %v622_v55  ;;  %1355 = vadd.xlane.f32.xlu0 %v1354_v18  ;;  %1310 = vadd.xlane.f32.xlu1 %v1309_v49  ;;  %v1271_v56 = vmul.f32 %v702_v37, %v2075_v52  ;;  %v1818_v37 = vld [vmem:[#allocation5 + $0xe0] sm:$0xff] }
 0x149   :  { %v624_v21 = vpop.f32.mrf.mxu0  ;;  %v704_v8 = vpop.f32.mrf.mxu1 }
 0x14a   :  { %v1312_v42 = vadd.f32 %v1239_v35, %v1238_v61  ;;  %v1240_v14 = vmul.f32 %v1812_v63, %v624_v21  ;;  %v1360_v4 = vadd.f32 %v1271_v56, %v1270_v19  ;;  %v1272_v52 = vmul.f32 %v704_v8, %v2107_v54 }
 0x14b   :  { %v626_v31 = vpop.f32.mrf.mxu0  ;;  %v706_v30 = vpop.f32.mrf.mxu1 }
 0x14c   :  { %v1241_v45 = vmul.f32 %v1813_v22, %v626_v31  ;;  %1358 = vadd.xlane.f32.xlu1 %v1357_v23  ;;  %1313 = vadd.xlane.f32.xlu0 %v1312_v42  ;;  %v1273_v5 = vmul.f32 %v706_v30, %v2097_v46  ;;  %v1820_v42 = vld [vmem:[#allocation5 + $0xf0] sm:$0xff]  ;;  %v1821_v30 = vld [vmem:[#allocation5 + $0xf8] sm:$0xff] }
 0x14d   :  { %v630_v43 = vpop.f32.mrf.mxu0  ;;  %v710_v17 = vpop.f32.mrf.mxu1 }
 0x14e   :  { %v1315_v7 = vadd.f32 %v1241_v45, %v1240_v14  ;;  %v1242_v40 = vmul.f32 %v1814_v48, %v630_v43  ;;  %v1274_v38 = vmul.f32 %v710_v17, %v2121_v3  ;;  %v1363_v39 = vadd.f32 %v1273_v5, %v1272_v52  ;;  %v1123_v52 = vld [vmem:[#allocation4 + $0x8] sm:$0xff] }
 0x14f   :  { %v632_v47 = vpop.f32.mrf.mxu0  ;;  %v712_v53 = vpop.f32.mrf.mxu1  ;;  %v1051_v43 = vadd.f32 %v2125_v15, %v2137_v26  ;;  %v1054_v5 = vadd.f32 %v2127_v57, %v2139_v27 }
 0x150   :  { %v1243_v33 = vmul.f32 %v1815_v44, %v632_v47  ;;  %1361 = vadd.xlane.f32.xlu0 %v1360_v4  ;;  %1316 = vadd.xlane.f32.xlu1 %v1315_v7  ;;  %v1275_v10 = vmul.f32 %v712_v53, %v2109_v51  ;;  %v1122_v4 = vld [vmem:[#allocation4] sm:$0xff] }
 0x151   :  { %v634_v0 = vpop.f32.mrf.mxu0  ;;  %v714_v13 = vpop.f32.mrf.mxu1  ;;  %v1138_v53 = vld [vmem:[#allocation4 + $0x80] sm:$0xff] }
 0x152   :  { %v1318_v46 = vadd.f32 %v1243_v33, %v1242_v40  ;;  %v1244_v29 = vmul.f32 %v1816_v16, %v634_v0  ;;  %v1366_v18 = vadd.f32 %v1275_v10, %v1274_v38  ;;  %v1276_v51 = vmul.f32 %v714_v13, %v2123_v12  ;;  %v1139_v0 = vld [vmem:[#allocation4 + $0x88] sm:$0xff]  ;;  %v1140_v10 = vld [vmem:[#allocation4 + $0x90] sm:$0xff] }
 0x153   :  { %v636_v58 = vpop.f32.mrf.mxu0  ;;  %v716_v59 = vpop.f32.mrf.mxu1 }
 0x154   :  { %v1245_v54 = vmul.f32 %v1817_v11, %v636_v58  ;;  %1364 = vadd.xlane.f32.xlu1 %v1363_v39  ;;  %1319 = vadd.xlane.f32.xlu0 %v1318_v46  ;;  %v1277_v24 = vmul.f32 %v716_v59, %v2111_v2  ;;  %v1125_v39 = vld [vmem:[#allocation4 + $0x18] sm:$0xff] }
 0x155   :  { %v640_v41 = vpop.f32.mrf.mxu0  ;;  %v720_v25 = vpop.f32.mrf.mxu1 }
 0x156   :  { %v1321_v49 = vadd.f32 %v1245_v54, %v1244_v29  ;;  %v1246_v36 = vmul.f32 %v1818_v37, %v640_v41  ;;  %v1278_v21 = vmul.f32 %v720_v25, %v2137_v26  ;;  %v1369_v19 = vadd.f32 %v1277_v24, %v1276_v51  ;;  %v1141_v54 = vld [vmem:[#allocation4 + $0x98] sm:$0xff]  ;;  %v1126_v24 = vld [vmem:[#allocation4 + $0x20] sm:$0xff] }
 0x157   :  { %v642_v55 = vpop.f32.mrf.mxu0  ;;  %v722_v3 = vpop.f32.mrf.mxu1 }
 0x158   :  { %v1247_v61 = vmul.f32 %v1819_v60, %v642_v55  ;;  %1367 = vadd.xlane.f32.xlu0 %v1366_v18  ;;  %1322 = vadd.xlane.f32.xlu1 %v1321_v49  ;;  %v1279_v8 = vmul.f32 %v722_v3, %v2125_v15  ;;  %v1124_v15 = vld [vmem:[#allocation4 + $0x10] sm:$0xff]  ;;  %v1142_v60 = vld [vmem:[#allocation4 + $0xa0] sm:$0xff] }
 0x159   :  { %v644_v34 = vpop.f32.mrf.mxu0  ;;  %v724_v35 = vpop.f32.mrf.mxu1 }
 0x15a   :  { %v1324_v2 = vadd.f32 %v1247_v61, %v1246_v36  ;;  %v1248_v31 = vmul.f32 %v1820_v42, %v644_v34  ;;  %v1372_v14 = vadd.f32 %v1279_v8, %v1278_v21  ;;  %v1280_v45 = vmul.f32 %v724_v35, %v2139_v27  ;;  %v1127_v35 = vld [vmem:[#allocation4 + $0x28] sm:$0xff] }
 0x15b   :  { %v646_v56 = vpop.f32.mrf.mxu0  ;;  %v726_v23 = vpop.f32.mrf.mxu1 }
 0x15c   :  { %v1249_v12 = vmul.f32 %v1821_v30, %v646_v56  ;;  %1370 = vadd.xlane.f32.xlu1 %v1369_v19  ;;  %1325 = vadd.xlane.f32.xlu0 %v1324_v2  ;;  %v1281_v63 = vmul.f32 %v726_v23, %v2127_v57  ;;  %v2821_v19 = vld [vmem:[#allocation25_spill] sm:$0xff]  ;;  %v2822_v56 = vld [vmem:[#allocation11_spill] sm:$0xff]  ;;  %v1143_v30 = vld [vmem:[#allocation4 + $0xa8] sm:$0xff] }
 0x15e   :  { %v1327_v22 = vadd.f32 %v1249_v12, %v1248_v31  ;;  %v1375_v17 = vadd.f32 %v1281_v63, %v1280_v45 }
 0x160   :  { %1373 = vadd.xlane.f32.xlu0 %v1372_v14  ;;  %1328 = vadd.xlane.f32.xlu1 %v1327_v22  ;;  %v1128_v14 = vld [vmem:[#allocation4 + $0x30] sm:$0xff] }
 0x164   :  { %1052 = vadd.xlane.f32.xlu0 %v1051_v43  ;;  %1376 = vadd.xlane.f32.xlu1 %v1375_v17 }
 0x168   :  { %1055 = vadd.xlane.f32.xlu1 %v1054_v5  ;;  %v2823_v5 = vld [vmem:[#allocation26_spill] sm:$0xff] }
 0x1ad   :  { %v1284_v7 = vpop.xlane.xlu0 %1283 }
 0x1ae   :  { %v1378_v47 = vadd.f32 %v1284_v7, %v1122_v4  ;;  %v2824_v7 = vld [vmem:[#allocation12_spill] sm:$0xff] }
 0x1b0   :  { %1410 = vst.msk [vmem:[#allocation4] sm:$0xff] %vm47_vm0, %v1378_v47 }
 0x1b1   :  { %v1332_v48 = vpop.xlane.xlu0 %1331  ;;  %v1287_v40 = vpop.xlane.xlu1 %1286 }
 0x1b2   :  { %v1394_v44 = vadd.f32 %v1332_v48, %v1138_v53  ;;  %v1379_v33 = vadd.f32 %v1287_v40, %v1123_v52  ;;  %v1144_v48 = vld [vmem:[#allocation4 + $0xb0] sm:$0xff] }
 0x1b4   :  { %1426 = vst.msk [vmem:[#allocation4 + $0x80] sm:$0xff] %vm47_vm0, %v1394_v44  ;;  %1411 = vst.msk [vmem:[#allocation4 + $0x8] sm:$0xff] %vm47_vm0, %v1379_v33  ;;  %v1129_v33 = vld [vmem:[#allocation4 + $0x38] sm:$0xff] }
 0x1b5   :  { %v1335_v26 = vpop.xlane.xlu1 %1334  ;;  %v1290_v57 = vpop.xlane.xlu0 %1289 }
 0x1b6   :  { %v1395_v27 = vadd.f32 %v1335_v26, %v1139_v0  ;;  %v1380_v13 = vadd.f32 %v1290_v57, %v1124_v15 }
 0x1b7   :  { %v1541_v38 = vld [vmem:[#allocation4] sm:$0xff] }
 0x1b8   :  { %v1573_v46 = vmul.f32 0.5, %v1541_v38  ;;  %1427 = vst.msk [vmem:[#allocation4 + $0x88] sm:$0xff] %vm47_vm0, %v1395_v27  ;;  %1412 = vst.msk [vmem:[#allocation4 + $0x10] sm:$0xff] %vm47_vm0, %v1380_v13  ;;  %v2825_v27 = vld [vmem:[#allocation27_spill] sm:$0xff]  ;;  %v2826_v38 = vld [vmem:[#allocation13_spill] sm:$0xff] }
 0x1b9   :  { %v1338_v58 = vpop.xlane.xlu0 %1337  ;;  %v1293_v59 = vpop.xlane.xlu1 %1292 }
 0x1ba   :  { %v1605_v16 = vadd.f32 %v1573_v46, %v2293_v6  ;;  %v1396_v29 = vadd.f32 %v1338_v58, %v1140_v10  ;;  %v1381_v11 = vadd.f32 %v1293_v59, %v1125_v39  ;;  %v1145_v58 = vld [vmem:[#allocation4 + $0xb8] sm:$0xff] }
 0x1bb   :  { %v1557_v41 = vld [vmem:[#allocation4 + $0x80] sm:$0xff]  ;;  %v1542_v25 = vld [vmem:[#allocation4 + $0x8] sm:$0xff] }
 0x1bc   :  { %1637 = vst.msk [vmem:[%s2776_s3] sm:$0xff] %vm47_vm0, %v1605_v16  ;;  %v1589_v18 = vmul.f32 0.5, %v1557_v41  ;;  %v1574_v49 = vmul.f32 0.5, %v1542_v25  ;;  %1428 = vst.msk [vmem:[#allocation4 + $0x90] sm:$0xff] %vm47_vm0, %v1396_v29  ;;  %v1130_v29 = vld [vmem:[#allocation4 + $0x40] sm:$0xff] }
 0x1bd   :  { %1413 = vst.msk [vmem:[#allocation4 + $0x18] sm:$0xff] %vm47_vm0, %v1381_v11  ;;  %v1341_v55 = vpop.xlane.xlu1 %1340  ;;  %v1296_v3 = vpop.xlane.xlu0 %1295 }
 0x1be   :  { %v1621_v6 = vadd.f32 %v1589_v18, %v2417_v50  ;;  %v1606_v51 = vadd.f32 %v1574_v49, %v2297_v1  ;;  %v1397_v37 = vadd.f32 %v1341_v55, %v1141_v54  ;;  %v1382_v36 = vadd.f32 %v1296_v3, %v1126_v24  ;;  %v2827_v24 = vld [vmem:[#allocation28_spill] sm:$0xff]  ;;  %v2828_v49 = vld [vmem:[#allocation14_spill] sm:$0xff] }
 0x1bf   :  { %v1558_v61 = vld [vmem:[#allocation4 + $0x88] sm:$0xff]  ;;  %v1543_v34 = vld [vmem:[#allocation4 + $0x10] sm:$0xff] }
 0x1c0   :  { %1653 = vst.msk [vmem:[%s2776_s3 + $0x80] sm:$0xff] %vm47_vm0, %v1621_v6  ;;  %1638 = vst.msk [vmem:[%s2776_s3 + $0x8] sm:$0xff] %vm47_vm0, %v1606_v51  ;;  %v1590_v21 = vmul.f32 0.5, %v1558_v61  ;;  %v1575_v50 = vmul.f32 0.5, %v1543_v34  ;;  %v1146_v51 = vld [vmem:[#allocation4 + $0xc0] sm:$0xff] }
 0x1c1   :  { %1429 = vst.msk [vmem:[#allocation4 + $0x98] sm:$0xff] %vm47_vm0, %v1397_v37  ;;  %1414 = vst.msk [vmem:[#allocation4 + $0x20] sm:$0xff] %vm47_vm0, %v1382_v36  ;;  %v1344_v1 = vpop.xlane.xlu0 %1343  ;;  %v1299_v8 = vpop.xlane.xlu1 %1298 }
 0x1c2   :  { %v1622_v2 = vadd.f32 %v1590_v21, %v2821_v19  ;;  %v1607_v23 = vadd.f32 %v1575_v50, %v2822_v56  ;;  %v1398_v42 = vadd.f32 %v1344_v1, %v1142_v60  ;;  %v1383_v31 = vadd.f32 %v1299_v8, %v1127_v35  ;;  %v1131_v60 = vld [vmem:[#allocation4 + $0x48] sm:$0xff]  ;;  %v2829_v50 = vld [vmem:[#allocation29_spill] sm:$0xff]  ;;  %v2830_v8 = vld [vmem:[#allocation15_spill] sm:$0xff] }
 0x1c3   :  { %v1559_v12 = vld [vmem:[#allocation4 + $0x90] sm:$0xff] }
 0x1c4   :  { %v1544_v63 = vld [vmem:[#allocation4 + $0x18] sm:$0xff]  ;;  %1654 = vst.msk [vmem:[%s2776_s3 + $0x88] sm:$0xff] %vm47_vm0, %v1622_v2  ;;  %1639 = vst.msk [vmem:[%s2776_s3 + $0x10] sm:$0xff] %vm47_vm0, %v1607_v23  ;;  %v1591_v22 = vmul.f32 0.5, %v1559_v12  ;;  %v1147_v23 = vld [vmem:[#allocation4 + $0xc8] sm:$0xff] }
 0x1c5   :  { %v1576_v45 = vmul.f32 0.5, %v1544_v63  ;;  %1430 = vst.msk [vmem:[#allocation4 + $0xa0] sm:$0xff] %vm47_vm0, %v1398_v42  ;;  %1415 = vst.msk [vmem:[#allocation4 + $0x28] sm:$0xff] %vm47_vm0, %v1383_v31  ;;  %v1347_v43 = vpop.xlane.xlu1 %1346  ;;  %v1302_v17 = vpop.xlane.xlu0 %1301 }
 0x1c6   :  { %v1623_v4 = vadd.f32 %v1591_v22, %v2823_v5  ;;  %v1399_v53 = vadd.f32 %v1347_v43, %v1143_v30  ;;  %v1384_v52 = vadd.f32 %v1302_v17, %v1128_v14  ;;  %v1132_v30 = vld [vmem:[#allocation4 + $0x50] sm:$0xff]  ;;  %v2832_v17 = vld [vmem:[#allocation16_spill] sm:$0xff] }
 0x1c7   :  { %v1608_v47 = vadd.f32 %v1576_v45, %v2824_v7  ;;  %v2831_v45 = vld [vmem:[#allocation30_spill] sm:$0xff] }
 0x1c8   :  { %v1560_v40 = vld [vmem:[#allocation4 + $0x98] sm:$0xff]  ;;  %v1545_v44 = vld [vmem:[#allocation4 + $0x20] sm:$0xff]  ;;  %1655 = vst.msk [vmem:[%s2776_s3 + $0x90] sm:$0xff] %vm47_vm0, %v1623_v4  ;;  %1431 = vst.msk [vmem:[#allocation4 + $0xa8] sm:$0xff] %vm47_vm0, %v1399_v53 }
 0x1c9   :  { %1640 = vst.msk [vmem:[%s2776_s3 + $0x18] sm:$0xff] %vm47_vm0, %v1608_v47  ;;  %v1592_v0 = vmul.f32 0.5, %v1560_v40  ;;  %v1577_v15 = vmul.f32 0.5, %v1545_v44  ;;  %1416 = vst.msk [vmem:[#allocation4 + $0x30] sm:$0xff] %vm47_vm0, %v1384_v52  ;;  %v1350_v26 = vpop.xlane.xlu0 %1349  ;;  %v1305_v57 = vpop.xlane.xlu1 %1304  ;;  %v1148_v47 = vld [vmem:[#allocation4 + $0xd0] sm:$0xff] }
 0x1ca   :  { %v1400_v39 = vadd.f32 %v1350_v26, %v1144_v48  ;;  %v1385_v46 = vadd.f32 %v1305_v57, %v1129_v33  ;;  %v1133_v48 = vld [vmem:[#allocation4 + $0x58] sm:$0xff]  ;;  %v2833_v26 = vld [vmem:[#allocation17_spill] sm:$0xff] }
 0x1cb   :  { %v1624_v13 = vadd.f32 %v1592_v0, %v2825_v27  ;;  %v1609_v10 = vadd.f32 %v1577_v15, %v2826_v38  ;;  %v1149_v38 = vld [vmem:[#allocation4 + $0xd8] sm:$0xff] }
 0x1cc   :  { %v1561_v59 = vld [vmem:[#allocation4 + $0xa0] sm:$0xff]  ;;  %v1546_v16 = vld [vmem:[#allocation4 + $0x28] sm:$0xff]  ;;  %1432 = vst.msk [vmem:[#allocation4 + $0xb0] sm:$0xff] %vm47_vm0, %v1400_v39  ;;  %1417 = vst.msk [vmem:[#allocation4 + $0x38] sm:$0xff] %vm47_vm0, %v1385_v46 }
 0x1cd   :  { %1656 = vst.msk [vmem:[%s2776_s3 + $0x98] sm:$0xff] %vm47_vm0, %v1624_v13  ;;  %1641 = vst.msk [vmem:[%s2776_s3 + $0x20] sm:$0xff] %vm47_vm0, %v1609_v10  ;;  %v1593_v11 = vmul.f32 0.5, %v1561_v59  ;;  %v1578_v54 = vmul.f32 0.5, %v1546_v16  ;;  %v1353_v41 = vpop.xlane.xlu1 %1352  ;;  %v1308_v25 = vpop.xlane.xlu0 %1307  ;;  %v1134_v46 = vld [vmem:[#allocation4 + $0x60] sm:$0xff] }
 0x1ce   :  { %v1401_v3 = vadd.f32 %v1353_v41, %v1145_v58  ;;  %v1386_v6 = vadd.f32 %v1308_v25, %v1130_v29 }
 0x1cf   :  { %v1625_v18 = vadd.f32 %v1593_v11, %v2827_v24  ;;  %v1610_v55 = vadd.f32 %v1578_v54, %v2828_v49  ;;  %v1562_v37 = vld [vmem:[#allocation4 + $0xa8] sm:$0xff]  ;;  %v2834_v11 = vld [vmem:[#allocation18_spill] sm:$0xff]  ;;  %v1150_v24 = vld [vmem:[#allocation4 + $0xe0] sm:$0xff] }
 0x1d0   :  { %v1547_v36 = vld [vmem:[#allocation4 + $0x30] sm:$0xff]  ;;  %v1594_v61 = vmul.f32 0.5, %v1562_v37  ;;  %1433 = vst.msk [vmem:[#allocation4 + $0xb8] sm:$0xff] %vm47_vm0, %v1401_v3  ;;  %1418 = vst.msk [vmem:[#allocation4 + $0x40] sm:$0xff] %vm47_vm0, %v1386_v6  ;;  %v2835_v37 = vld [vmem:[#allocation31_spill] sm:$0xff] }
 0x1d1   :  { %1657 = vst.msk [vmem:[%s2776_s3 + $0xa0] sm:$0xff] %vm47_vm0, %v1625_v18  ;;  %1642 = vst.msk [vmem:[%s2776_s3 + $0x28] sm:$0xff] %vm47_vm0, %v1610_v55  ;;  %v1579_v34 = vmul.f32 0.5, %v1547_v36  ;;  %v1356_v35 = vpop.xlane.xlu0 %1355  ;;  %v1311_v21 = vpop.xlane.xlu1 %1310  ;;  %v1135_v55 = vld [vmem:[#allocation4 + $0x68] sm:$0xff] }
 0x1d2   :  { %v1626_v1 = vadd.f32 %v1594_v61, %v2829_v50  ;;  %v1402_v2 = vadd.f32 %v1356_v35, %v1146_v51  ;;  %v1387_v56 = vadd.f32 %v1311_v21, %v1131_v60  ;;  %v2836_v60 = vld [vmem:[#allocation19_spill] sm:$0xff]  ;;  %v1151_v21 = vld [vmem:[#allocation4 + $0xe8] sm:$0xff] }
 0x1d3   :  { %v1611_v19 = vadd.f32 %v1579_v34, %v2830_v8  ;;  %v1563_v42 = vld [vmem:[#allocation4 + $0xb0] sm:$0xff]  ;;  %v1548_v31 = vld [vmem:[#allocation4 + $0x38] sm:$0xff] }
 0x1d4   :  { %1658 = vst.msk [vmem:[%s2776_s3 + $0xa8] sm:$0xff] %vm47_vm0, %v1626_v1  ;;  %v1595_v12 = vmul.f32 0.5, %v1563_v42  ;;  %v1580_v63 = vmul.f32 0.5, %v1548_v31  ;;  %1434 = vst.msk [vmem:[#allocation4 + $0xc0] sm:$0xff] %vm47_vm0, %v1402_v2  ;;  %v1136_v8 = vld [vmem:[#allocation4 + $0x70] sm:$0xff]  ;;  %v2837_v42 = vld [vmem:[#allocation32_spill] sm:$0xff] }
 0x1d5   :  { %1643 = vst.msk [vmem:[%s2776_s3 + $0x30] sm:$0xff] %vm47_vm0, %v1611_v19  ;;  %1419 = vst.msk [vmem:[#allocation4 + $0x48] sm:$0xff] %vm47_vm0, %v1387_v56  ;;  %v1359_v14 = vpop.xlane.xlu1 %1358  ;;  %v1314_v22 = vpop.xlane.xlu0 %1313 }
 0x1d6   :  { %v1627_v43 = vadd.f32 %v1595_v12, %v2831_v45  ;;  %v1612_v5 = vadd.f32 %v1580_v63, %v2832_v17  ;;  %v1403_v4 = vadd.f32 %v1359_v14, %v1147_v23  ;;  %v1388_v7 = vadd.f32 %v1314_v22, %v1132_v30  ;;  %v2838_v30 = vld [vmem:[#allocation20_spill] sm:$0xff]  ;;  %v1152_v22 = vld [vmem:[#allocation4 + $0xf0] sm:$0xff]  ;;  %v1137_v17 = vld [vmem:[#allocation4 + $0x78] sm:$0xff] }
 0x1d7   :  { %v1564_v53 = vld [vmem:[#allocation4 + $0xb8] sm:$0xff]  ;;  %v1549_v52 = vld [vmem:[#allocation4 + $0x40] sm:$0xff] }
 0x1d8   :  { %1659 = vst.msk [vmem:[%s2776_s3 + $0xb0] sm:$0xff] %vm47_vm0, %v1627_v43  ;;  %1644 = vst.msk [vmem:[%s2776_s3 + $0x38] sm:$0xff] %vm47_vm0, %v1612_v5  ;;  %v1596_v40 = vmul.f32 0.5, %v1564_v53  ;;  %v1581_v44 = vmul.f32 0.5, %v1549_v52  ;;  %v2839_v52 = vld [vmem:[#allocation21_spill] sm:$0xff] }
 0x1d9   :  { %1435 = vst.msk [vmem:[#allocation4 + $0xc8] sm:$0xff] %vm47_vm0, %v1403_v4  ;;  %1420 = vst.msk [vmem:[#allocation4 + $0x50] sm:$0xff] %vm47_vm0, %v1388_v7  ;;  %v1362_v33 = vpop.xlane.xlu0 %1361  ;;  %v1317_v0 = vpop.xlane.xlu1 %1316 }
 0x1da   :  { %v1628_v15 = vadd.f32 %v1596_v40, %v2467_v20  ;;  %v1613_v57 = vadd.f32 %v1581_v44, %v2833_v26  ;;  %v1404_v27 = vadd.f32 %v1362_v33, %v1148_v47  ;;  %v1389_v13 = vadd.f32 %v1317_v0, %v1133_v48  ;;  %v959_v33 = vld [vmem:[#allocation3 + $0xf0] sm:$0xff]  ;;  %v1153_v26 = vld [vmem:[#allocation4 + $0xf8] sm:$0xff] }
 0x1db   :  { %v1565_v10 = vld [vmem:[#allocation4 + $0xc0] sm:$0xff] }
 0x1dc   :  { %v1550_v39 = vld [vmem:[#allocation4 + $0x48] sm:$0xff]  ;;  %1660 = vst.msk [vmem:[%s2776_s3 + $0xb8] sm:$0xff] %vm47_vm0, %v1628_v15  ;;  %1645 = vst.msk [vmem:[%s2776_s3 + $0x40] sm:$0xff] %vm47_vm0, %v1613_v57  ;;  %v1597_v58 = vmul.f32 0.5, %v1565_v10  ;;  %v2840_v10 = vld [vmem:[#allocation22_spill] sm:$0xff] }
 0x1dd   :  { %v1582_v20 = vmul.f32 0.5, %v1550_v39  ;;  %1436 = vst.msk [vmem:[#allocation4 + $0xd0] sm:$0xff] %vm47_vm0, %v1404_v27  ;;  %1421 = vst.msk [vmem:[#allocation4 + $0x58] sm:$0xff] %vm47_vm0, %v1389_v13  ;;  %v1365_v59 = vpop.xlane.xlu1 %1364  ;;  %v1320_v16 = vpop.xlane.xlu0 %1319 }
 0x1de   :  { %v1629_v29 = vadd.f32 %v1597_v58, %v2484_v62  ;;  %v1405_v41 = vadd.f32 %v1365_v59, %v1149_v38  ;;  %v1390_v25 = vadd.f32 %v1320_v16, %v1134_v46  ;;  %v960_v16 = vld [vmem:[#allocation3 + $0xf8] sm:$0xff] }
 0x1df   :  { %v1614_v54 = vadd.f32 %v1582_v20, %v2834_v11 }
 0x1e0   :  { %v1566_v18 = vld [vmem:[#allocation4 + $0xc8] sm:$0xff]  ;;  %v1551_v49 = vld [vmem:[#allocation4 + $0x50] sm:$0xff]  ;;  %1661 = vst.msk [vmem:[%s2776_s3 + $0xc0] sm:$0xff] %vm47_vm0, %v1629_v29  ;;  %1437 = vst.msk [vmem:[#allocation4 + $0xd8] sm:$0xff] %vm47_vm0, %v1405_v41 }
 0x1e1   :  { %1646 = vst.msk [vmem:[%s2776_s3 + $0x48] sm:$0xff] %vm47_vm0, %v1614_v54  ;;  %v1598_v3 = vmul.f32 0.5, %v1566_v18  ;;  %v1583_v62 = vmul.f32 0.5, %v1551_v49  ;;  %1422 = vst.msk [vmem:[#allocation4 + $0x60] sm:$0xff] %vm47_vm0, %v1390_v25  ;;  %v1368_v6 = vpop.xlane.xlu0 %1367  ;;  %v1323_v51 = vpop.xlane.xlu1 %1322  ;;  %v2841_v41 = vld [vmem:[#allocation23_spill] sm:$0xff] }
 0x1e2   :  { %v1406_v34 = vadd.f32 %v1368_v6, %v1150_v24  ;;  %v1391_v35 = vadd.f32 %v1323_v51, %v1135_v55 }
 0x1e3   :  { %v1630_v36 = vadd.f32 %v1598_v3, %v2835_v37  ;;  %v1615_v61 = vadd.f32 %v1583_v62, %v2836_v60 }
 0x1e4   :  { %v1567_v50 = vld [vmem:[#allocation4 + $0xd0] sm:$0xff]  ;;  %v1552_v1 = vld [vmem:[#allocation4 + $0x58] sm:$0xff]  ;;  %1438 = vst.msk [vmem:[#allocation4 + $0xe0] sm:$0xff] %vm47_vm0, %v1406_v34  ;;  %1423 = vst.msk [vmem:[#allocation4 + $0x68] sm:$0xff] %vm47_vm0, %v1391_v35 }
 0x1e5   :  { %1662 = vst.msk [vmem:[%s2776_s3 + $0xc8] sm:$0xff] %vm47_vm0, %v1630_v36  ;;  %1647 = vst.msk [vmem:[%s2776_s3 + $0x50] sm:$0xff] %vm47_vm0, %v1615_v61  ;;  %v1599_v19 = vmul.f32 0.5, %v1567_v50  ;;  %v1584_v2 = vmul.f32 0.5, %v1552_v1  ;;  %v1371_v56 = vpop.xlane.xlu1 %1370  ;;  %v1326_v23 = vpop.xlane.xlu0 %1325 }
 0x1e6   :  { %v1407_v63 = vadd.f32 %v1371_v56, %v1151_v21  ;;  %v1392_v14 = vadd.f32 %v1326_v23, %v1136_v8 }
 0x1e7   :  { %v1631_v31 = vadd.f32 %v1599_v19, %v2837_v42  ;;  %v1616_v12 = vadd.f32 %v1584_v2, %v2838_v30  ;;  %v1568_v45 = vld [vmem:[#allocation4 + $0xd8] sm:$0xff] }
 0x1e8   :  { %v1553_v43 = vld [vmem:[#allocation4 + $0x60] sm:$0xff]  ;;  %v1600_v5 = vmul.f32 0.5, %v1568_v45  ;;  %1439 = vst.msk [vmem:[#allocation4 + $0xe8] sm:$0xff] %vm47_vm0, %v1407_v63  ;;  %1424 = vst.msk [vmem:[#allocation4 + $0x70] sm:$0xff] %vm47_vm0, %v1392_v14 }
 0x1e9   :  { %1663 = vst.msk [vmem:[%s2776_s3 + $0xd0] sm:$0xff] %vm47_vm0, %v1631_v31  ;;  %1648 = vst.msk [vmem:[%s2776_s3 + $0x58] sm:$0xff] %vm47_vm0, %v1616_v12  ;;  %v1585_v4 = vmul.f32 0.5, %v1553_v43  ;;  %v1374_v7 = vpop.xlane.xlu0 %1373  ;;  %v1329_v47 = vpop.xlane.xlu1 %1328 }
 0x1ea   :  { %v1632_v53 = vadd.f32 %v1600_v5, %v2526_v32  ;;  %v1408_v40 = vadd.f32 %v1374_v7, %v1152_v22  ;;  %v1393_v44 = vadd.f32 %v1329_v47, %v1137_v17 }
 0x1eb   :  { %v1617_v48 = vadd.f32 %v1585_v4, %v2839_v52  ;;  %v1569_v0 = vld [vmem:[#allocation4 + $0xe0] sm:$0xff]  ;;  %v1554_v15 = vld [vmem:[#allocation4 + $0x68] sm:$0xff] }
 0x1ec   :  { %1664 = vst.msk [vmem:[%s2776_s3 + $0xd8] sm:$0xff] %vm47_vm0, %v1632_v53  ;;  %v1601_v57 = vmul.f32 0.5, %v1569_v0  ;;  %v1586_v32 = vmul.f32 0.5, %v1554_v15  ;;  %1440 = vst.msk [vmem:[#allocation4 + $0xf0] sm:$0xff] %vm47_vm0, %v1408_v40 }
 0x1ed   :  { %1649 = vst.msk [vmem:[%s2776_s3 + $0x60] sm:$0xff] %vm47_vm0, %v1617_v48  ;;  %1425 = vst.msk [vmem:[#allocation4 + $0x78] sm:$0xff] %vm47_vm0, %v1393_v44  ;;  %v1053_v27 = vpop.xlane.xlu0 %1052  ;;  %v1377_v13 = vpop.xlane.xlu1 %1376 }
 0x1ee   :  { %v1633_v38 = vadd.f32 %v1601_v57, %v2528_v28  ;;  %v1618_v39 = vadd.f32 %v1586_v32, %v2840_v10  ;;  %v1087_v46 = vadd.f32 %v1053_v27, %v959_v33  ;;  %v1409_v58 = vadd.f32 %v1377_v13, %v1153_v26 }
 0x1ef   :  { %v1570_v20 = vld [vmem:[#allocation4 + $0xe8] sm:$0xff]  ;;  %v1555_v59 = vld [vmem:[#allocation4 + $0x70] sm:$0xff] }
 0x1f0   :  { %1665 = vst.msk [vmem:[%s2776_s3 + $0xe0] sm:$0xff] %vm47_vm0, %v1633_v38  ;;  %1650 = vst.msk [vmem:[%s2776_s3 + $0x68] sm:$0xff] %vm47_vm0, %v1618_v39  ;;  %v1602_v29 = vmul.f32 0.5, %v1570_v20  ;;  %v1587_v11 = vmul.f32 0.5, %v1555_v59 }
 0x1f1   :  { %1120 = vst.msk [vmem:[#allocation3 + $0xf0] sm:$0xff] %vm47_vm0, %v1087_v46  ;;  %1441 = vst.msk [vmem:[#allocation4 + $0xf8] sm:$0xff] %vm47_vm0, %v1409_v58  ;;  %v1056_v28 = vpop.xlane.xlu1 %1055 }
 0x1f2   :  { %v1634_v54 = vadd.f32 %v1602_v29, %v2542_v9  ;;  %v1619_v25 = vadd.f32 %v1587_v11, %v2841_v41  ;;  %v1088_v24 = vadd.f32 %v1056_v28, %v960_v16  ;;  %v2842_v9 = vld [vmem:[#allocation24_spill] sm:$0xff] }
 0x1f3   :  { %v1571_v18 = vld [vmem:[#allocation4 + $0xf0] sm:$0xff] }
 0x1f4   :  { %v1556_v49 = vld [vmem:[#allocation4 + $0x78] sm:$0xff]  ;;  %1666 = vst.msk [vmem:[%s2776_s3 + $0xe8] sm:$0xff] %vm47_vm0, %v1634_v54  ;;  %1651 = vst.msk [vmem:[%s2776_s3 + $0x70] sm:$0xff] %vm47_vm0, %v1619_v25  ;;  %v1603_v3 = vmul.f32 0.5, %v1571_v18 }
 0x1f5   :  { %v1588_v55 = vmul.f32 0.5, %v1556_v49  ;;  %1121 = vst.msk [vmem:[#allocation3 + $0xf8] sm:$0xff] %vm47_vm0, %v1088_v24 }
 0x1f7   :  { %v1620_v62 = vadd.f32 %v1588_v55, %v2842_v9 }
 0x1f8   :  { %v1474_v6 = vld [vmem:[#allocation3 + $0xf0] sm:$0xff]  ;;  %v1572_v51 = vld [vmem:[#allocation4 + $0xf8] sm:$0xff] }
 0x1f9   :  { %1652 = vst.msk [vmem:[%s2776_s3 + $0x78] sm:$0xff] %vm47_vm0, %v1620_v62  ;;  %1507 = vst.msk [vmem:[%s2775_s2 + $0xf0] sm:$0xff] %vm47_vm0, %v1474_v6  ;;  %v1635_v37 = vadd.f32 %v1603_v3, %v1474_v6  ;;  %v1604_v36 = vmul.f32 0.5, %v1572_v51 }
 0x1fb   :  { %1667 = vst.msk [vmem:[%s2776_s3 + $0xf0] sm:$0xff] %vm47_vm0, %v1635_v37 }
 0x1fc   :  { %v1475_v60 = vld [vmem:[#allocation3 + $0xf8] sm:$0xff] }
 0x1fd   :  { %1508 = vst.msk [vmem:[%s2775_s2 + $0xf8] sm:$0xff] %vm47_vm0, %v1475_v60  ;;  %v1636_v61 = vadd.f32 %v1604_v36, %v1475_v60 }
 0x1ff   :  { %1668 = vst.msk [vmem:[%s2776_s3 + $0xf8] sm:$0xff] %vm47_vm0, %v1636_v61 }
 0x200   :  { %1677 = vsyncpa [#allocation6], 1 }
 0x201   :  { %1678 = vsyncpa [#allocation8], 1 }

</bundles_post_ra>
